<compile_context>
chip_gen: v7x
topology: tpu7x:2x2x1
jax: 0.10.0
libtpu: 0.0.40
codegen_flags: <defaults>
</compile_context>

<pallas_src>
import jax
import jax.numpy as jnp
from jax.experimental import pallas as pl
from jax.experimental.pallas import tpu as pltpu

POS_DIM = 40
NUM_CLASSES = 19
NUM_CLASSES_PAD = 32              # classes padded to a sublane-friendly 32 lanes
IN_DIM = 4 * (256 + POS_DIM)      # 1184
BN_EPS = 1e-5
TILE_L1 = 1024                    # layer-1 token tile (v7x 64 MiB VMEM safe)
TILE_L234 = 2048                  # layers 2-4 token tile (amortize per-step overhead)
VMEM_LIMIT_BYTES = 44 * 1024 * 1024   # ~20 MiB headroom below v7x's 64 MiB physical VMEM


# ---------------------------------------------------------------------------
# Tile planning: per-batch token tiles that divide the (possibly padded) N.
# ---------------------------------------------------------------------------
def _round_up(x, m):
    return ((x + m - 1) // m) * m


def _largest_div_tile(n, limit):
    """Largest multiple of 128 <= limit that divides n (n must be mult of 128)."""
    t = min(limit, n)
    t -= t % 128
    while t >= 128:
        if n % t == 0:
            return t
        t -= 128
    return 128


def _plan_tiles(n):
    """Returns (n_pad, tile_layer1, tile_layers234)."""
    if n <= TILE_L1:
        return n, n, n                     # single tile per batch, no padding
    n_pad = n if n % 128 == 0 else _round_up(n, 128)
    return n_pad, _largest_div_tile(n_pad, TILE_L1), _largest_div_tile(n_pad, TILE_L234)


# ---------------------------------------------------------------------------
# One fused layer: (optional BN-affine + ReLU) -> bf16 matmul -> +bias,
# with optional per-tile batch-statistics partials.
# x: (B, Cin, N_pad) if channels_first else (B, N_pad, Cin).
# Returns (B, N_pad, Cout) in out_dtype (+ per-tile stats if emit_stats).
# ---------------------------------------------------------------------------
def _layer(x, w_bf16, b, scale, shift, *, channels_first, emit_stats,
           out_dtype, tile, n_valid, n_pad):
    if channels_first:
        batch, cin, _ = x.shape
    else:
        batch, _, cin = x.shape
    cout = w_bf16.shape[1]
    n_tiles = n_pad // tile
    apply_bn = scale is not None
    assert not (channels_first and apply_bn)      # BN only precedes layers 2..4
    need_mask = emit_stats and (n_pad != n_valid)

    def kernel(*refs):
        i = 0
        x_ref = refs[i]; i += 1
        if apply_bn:
            sc_ref, sh_ref = refs[i], refs[i + 1]; i += 2
        w_ref, b_ref = refs[i], refs[i + 1]; i += 2
        out_ref = refs[i]; i += 1

        xv = x_ref[...]
        if apply_bn:
            # folded train-mode BN (scale/shift from batch stats) + ReLU, in f32
            xf = xv.astype(jnp.float32)
            xf = jnp.maximum(xf * sc_ref[...] + sh_ref[...], 0.0)
            xm = xf.astype(jnp.bfloat16)
        else:
            xm = xv.astype(jnp.bfloat16)

        if channels_first:
            # xm: (Cin, tile) — contract dim 0 against dim 0 of W; the MXU takes
            # the transposed LHS natively, so no XLA/XLU transpose is needed.
            h = jax.lax.dot_general(
                xm, w_ref[...],
                dimension_numbers=(((0,), (0,)), ((), ())),
                preferred_element_type=jnp.float32)
        else:
            h = jnp.dot(xm, w_ref[...], preferred_element_type=jnp.float32)
        h = h + b_ref[...]
        out_ref[...] = h.astype(out_dtype)

        if emit_stats:
            ssum_ref, ssq_ref = refs[i], refs[i + 1]
            if need_mask:
                # zero out padded token rows so batch statistics stay exact
                row = (pl.program_id(1) * tile
                       + jax.lax.broadcasted_iota(jnp.int32, (tile, 1), 0))
                hm = jnp.where(row < n_valid, h, 0.0)
            else:
                hm = h
            s = jnp.sum(hm, axis=0, keepdims=True)        # [1, Cout]
            q = jnp.sum(hm * h, axis=0, keepdims=True)    # [1, Cout]
            ssum_ref[...] = jnp.broadcast_to(s, (8, cout))
            ssq_ref[...] = jnp.broadcast_to(q, (8, cout))

    if channels_first:
        x_spec = pl.BlockSpec((None, cin, tile), lambda bb, j: (bb, 0, j))
    else:
        x_spec = pl.BlockSpec((None, tile, cin), lambda bb, j: (bb, j, 0))

    in_specs = [x_spec]
    args = [x]
    if apply_bn:
        const_vec = pl.BlockSpec((1, cin), lambda bb, j: (0, 0))
        in_specs += [const_vec, const_vec]
        args += [scale, shift]
    in_specs += [pl.BlockSpec((cin, cout), lambda bb, j: (0, 0)),   # resident weights
                 pl.BlockSpec((1, cout), lambda bb, j: (0, 0))]
    args += [w_bf16, b]

    out_shape = [jax.ShapeDtypeStruct((batch, n_pad, cout), out_dtype)]
    out_specs = [pl.BlockSpec((None, tile, cout), lambda bb, j: (bb, j, 0))]
    if emit_stats:
        out_shape += [jax.ShapeDtypeStruct((batch * n_tiles * 8, cout), jnp.float32)] * 2
        out_specs += [pl.BlockSpec((8, cout), lambda bb, j: (bb * n_tiles + j, 0))] * 2

    outs = pl.pallas_call(
        kernel,
        grid=(batch, n_tiles),
        in_specs=in_specs,
        out_specs=tuple(out_specs),
        out_shape=tuple(out_shape),
        compiler_params=pltpu.CompilerParams(
            dimension_semantics=("parallel", "parallel"),
            vmem_limit_bytes=VMEM_LIMIT_BYTES),
    )(*args)

    if emit_stats:
        return outs
    return outs[0]


def _bn_fold(ssum_tiles, ssq_tiles, gamma, beta, count):
    """Fold exact train-mode batch statistics + BN affine into scale/shift."""
    ssum = jnp.sum(ssum_tiles[::8], axis=0)                 # [C]
    ssq = jnp.sum(ssq_tiles[::8], axis=0)                   # [C]
    mean = ssum / count
    var = jnp.maximum(ssq / count - mean * mean, 0.0)       # biased var (PyTorch train BN)
    scale = gamma * jax.lax.rsqrt(var + BN_EPS)
    shift = beta - mean * scale
    return scale[None, :], shift[None, :]


def imnet_apply(params, x, *, channels_first):
    """x: (B, IN_DIM, N) if channels_first else (B, N, IN_DIM).
    Returns logits (B, N, NUM_CLASSES) float32."""
    if channels_first:
        batch, _, n = x.shape
    else:
        batch, n, _ = x.shape
    n_pad, tile1, tile234 = _plan_tiles(n)
    if n_pad != n:
        pad = n_pad - n
        pad_cfg = ((0, 0), (0, 0), (0, pad)) if channels_first else ((0, 0), (0, pad), (0, 0))
        x = jnp.pad(x, pad_cfg)
    count = batch * n                                       # valid tokens for BN stats

    h1, s1, q1 = _layer(x, params["w1"], params["b1"], None, None,
                        channels_first=channels_first, emit_stats=True,
                        out_dtype=jnp.bfloat16, tile=tile1, n_valid=n, n_pad=n_pad)
    sc1, sh1 = _bn_fold(s1, q1, params["g1"], params["be1"], count)

    h2, s2, q2 = _layer(h1, params["w2"], params["b2"], sc1, sh1,
                        channels_first=False, emit_stats=True,
                        out_dtype=jnp.bfloat16, tile=tile234, n_valid=n, n_pad=n_pad)
    sc2, sh2 = _bn_fold(s2, q2, params["g2"], params["be2"], count)

    h3, s3, q3 = _layer(h2, params["w3"], params["b3"], sc2, sh2,
                        channels_first=False, emit_stats=True,
                        out_dtype=jnp.bfloat16, tile=tile234, n_valid=n, n_pad=n_pad)
    sc3, sh3 = _bn_fold(s3, q3, params["g3"], params["be3"], count)

    out = _layer(h3, params["w4"], params["b4"], sc3, sh3,
                 channels_first=False, emit_stats=False,
                 out_dtype=jnp.float32, tile=tile234, n_valid=n, n_pad=n_pad)
    # (B, N_pad, 32) -> (B, N, 19): cheap, only 19 channels survive
    return out[:, :n, :NUM_CLASSES]


# ---------------------------------------------------------------------------
# ifa_feat (default, non-local, non-unfold branch) — plain-JAX glue, no gather
# on the integer-upscale fast path; rel coords computed analytically.
# TODO(synk): ifa_feat's source was not supplied with the module; implemented
#             per the public IFA reference (nearest grid_sample + rel coords).
# ---------------------------------------------------------------------------
def _coord_1d(n):
    return -1.0 + (2.0 * jnp.arange(n, dtype=jnp.float32) + 1.0) / n


def ifa_feat(res, size):
    B, C, hh, ww = res.shape
    h, w = size
    cy, cx = _coord_1d(h), _coord_1d(w)
    iy = jnp.clip(jnp.floor((cy + 1.0) * hh * 0.5), 0, hh - 1).astype(jnp.int32)
    ix = jnp.clip(jnp.floor((cx + 1.0) * ww * 0.5), 0, ww - 1).astype(jnp.int32)
    # relative coordinates (analytic, no gather of the coord grid)
    qy = -1.0 + (2.0 * iy.astype(jnp.float32) + 1.0) / hh
    qx = -1.0 + (2.0 * ix.astype(jnp.float32) + 1.0) / ww
    rel_y = (cy - qy) * hh                                   # (h,)
    rel_x = (cx - qx) * ww                                   # (w,)
    rel = jnp.stack([jnp.broadcast_to(rel_y[:, None], (h, w)),
                     jnp.broadcast_to(rel_x[None, :], (h, w))], axis=-1)
    rel = jnp.broadcast_to(rel.reshape(1, h * w, 2), (B, h * w, 2))

    if h % hh == 0 and w % ww == 0:
        # integer-ratio nearest upsample == layout-only repeat (no XLA gather)
        rh, rw = h // hh, w // ww
        q = jnp.broadcast_to(res[:, :, :, None, :, None],
                             (B, C, hh, rh, ww, rw)).reshape(B, C, h, w)
    else:
        flat = res.reshape(B, C, hh * ww)
        idx = (iy[:, None] * ww + ix[None, :]).reshape(-1)
        q = jnp.take(flat, idx, axis=2).reshape(B, C, h, w)
    q_feat = jnp.transpose(q.reshape(B, C, h * w), (0, 2, 1))   # (B, N, C)
    return rel, q_feat


# ---------------------------------------------------------------------------
# ifa_simfpn forward (default config)
# ---------------------------------------------------------------------------
def ifa_simfpn_forward(params, x, size, level=0, after_cat=False, channels_last=False):
    h, w = size
    if not after_cat:
        # default config: ultra_pe / learn_pe / local / unfold all False.
        # TODO(synk): SpatialEncoding / PositionEmbeddingLearned / local /
        #             unfold branches not implemented (sources not provided).
        # TODO(synk): with ultra_pe=False this branch emits 2 rel-coord dims per
        #             level (258), while imnet's IN_DIM=1184 assumes pos_dim=40;
        #             matches the PyTorch module, which has the same mismatch.
        rel_coord, q_feat = ifa_feat(x, (h, w))
        return jnp.concatenate([rel_coord, q_feat], axis=-1)   # (B, h*w, 256+2)

    # after_cat: x is (B, IN_DIM, N) like the PyTorch Conv1d input (consumed
    # directly, no HBM transpose), or (B, N, IN_DIM) with channels_last=True.
    B = x.shape[0]
    n = x.shape[1] if channels_last else x.shape[2]
    logits = imnet_apply(params, x, channels_first=not channels_last)   # (B, N, 19)
    out = jnp.transpose(logits, (0, 2, 1)).reshape(B, NUM_CLASSES, h, w)
    return out


# ---------------------------------------------------------------------------
# deterministic parameter init (shapes from the module __init__, num_layer=2)
# ---------------------------------------------------------------------------
def init_params(key):
    ks = jax.random.split(key, 4)

    def winit(k, shape):
        # matmul weights live in bf16 (MXU operands); everything else f32
        return (jax.random.normal(k, shape, jnp.float32) * 0.02).astype(jnp.bfloat16)

    w4 = jax.random.normal(ks[3], (256, NUM_CLASSES), jnp.float32) * 0.02
    w4p = jnp.zeros((256, NUM_CLASSES_PAD), jnp.float32).at[:, :NUM_CLASSES].set(w4)

    return {
        "w1": winit(ks[0], (IN_DIM, 512)), "b1": jnp.zeros((1, 512), jnp.float32),
        "g1": jnp.ones((512,), jnp.float32), "be1": jnp.zeros((512,), jnp.float32),
        "w2": winit(ks[1], (512, 256)), "b2": jnp.zeros((1, 256), jnp.float32),
        "g2": jnp.ones((256,), jnp.float32), "be2": jnp.zeros((256,), jnp.float32),
        "w3": winit(ks[2], (256, 256)), "b3": jnp.zeros((1, 256), jnp.float32),
        "g3": jnp.ones((256,), jnp.float32), "be3": jnp.zeros((256,), jnp.float32),
        "w4": w4p.astype(jnp.bfloat16),                      # zero-padded 19 -> 32
        "b4": jnp.zeros((1, NUM_CLASSES_PAD), jnp.float32),
    }


if __name__ == "__main__":
    key = jax.random.PRNGKey(0)
    k_params, k_feat, k_cat = jax.random.split(key, 3)

    params = init_params(k_params)

    B, h, w = 2, 8, 8

    # Branch 1 (after_cat=False): low-res feature map -> per-pixel context tokens.
    feat = jax.random.normal(k_feat, (B, 256, 4, 4), jnp.float32)
    ctx = ifa_simfpn_forward(params, feat, (h, w), level=1, after_cat=False)
    assert ctx.shape == (B, h * w, 256 + 2)

    # Branch 2 (after_cat=True): concatenated multilevel context -> imnet (Pallas),
    # fed channels-first like the PyTorch Conv1d stack (no HBM transpose needed).
    x_cat = jax.random.normal(k_cat, (B, IN_DIM, h * w), jnp.float32)
    out = ifa_simfpn_forward(params, x_cat, (h, w), after_cat=True)
    assert out.shape == (B, NUM_CLASSES, h, w)

    # Tokens-major path (same math, different layer-1 dot orientation).
    out2 = ifa_simfpn_forward(params, jnp.transpose(x_cat, (0, 2, 1)), (h, w),
                              after_cat=True, channels_last=True)
    assert out2.shape == (B, NUM_CLASSES, h, w)
    assert jnp.allclose(out, out2, atol=0.1, rtol=0.1)

    jax.block_until_ready((ctx, out, out2))
    print("KERNEL_OK")
</pallas_src>

<mosaic_0001>
module attributes {stable_mosaic.version = 11 : i64} {
  func.func @kernel(%arg0: i32, %arg1: i32, %arg2: memref<1x1184x64xf32, #tpu.memory_space<vmem>>, %arg3: memref<1184x512xbf16, #tpu.memory_space<vmem>>, %arg4: memref<1x512xf32, #tpu.memory_space<vmem>>, %arg5: memref<1x64x512xbf16, #tpu.memory_space<vmem>>, %arg6: memref<8x512xf32, #tpu.memory_space<vmem>>, %arg7: memref<8x512xf32, #tpu.memory_space<vmem>>) attributes {dimension_semantics = [#tpu.dimension_semantics<parallel>, #tpu.dimension_semantics<parallel>], iteration_bounds = array<i64: 2, 1>, scalar_prefetch = 0 : i64, scratch_operands = 0 : i64, tpu.core_type = #tpu.core_type<tc>, window_params = [{transform_indices = @transform_0, window_bounds = array<i64: 1, 1184, 64>}, {pipeline_mode = #tpu.pipeline_mode<synchronous>, transform_indices = @transform_1, window_bounds = array<i64: 1184, 512>}, {pipeline_mode = #tpu.pipeline_mode<synchronous>, transform_indices = @transform_2, window_bounds = array<i64: 1, 512>}, {transform_indices = @transform_3, window_bounds = array<i64: 1, 64, 512>}, {transform_indices = @transform_4, window_bounds = array<i64: 8, 512>}, {transform_indices = @transform_5, window_bounds = array<i64: 8, 512>}]} {
    %c0 = arith.constant 0 : index
    %c0_0 = arith.constant 0 : index
    %c0_1 = arith.constant 0 : index
    %0 = vector.load %arg2[%c0, %c0_0, %c0_1] : memref<1x1184x64xf32, #tpu.memory_space<vmem>>, vector<1x1184x64xf32>
    %1 = vector.shape_cast %0 : vector<1x1184x64xf32> to vector<1184x64xf32>
    %2 = arith.truncf %1 : vector<1184x64xf32> to vector<1184x64xbf16>
    %c0_2 = arith.constant 0 : index
    %c0_3 = arith.constant 0 : index
    %3 = vector.load %arg3[%c0_2, %c0_3] : memref<1184x512xbf16, #tpu.memory_space<vmem>>, vector<1184x512xbf16>
    %cst = arith.constant dense<0.000000e+00> : vector<64x512xf32>
    %4 = tpu.matmul %2, %3, %cst {dimension_numbers = #tpu.dot_dimension_numbers<[0], [0], [1], [1], [0, 1, 1, 1], [], []>} : vector<1184x64xbf16>, vector<1184x512xbf16>, vector<64x512xf32> -> vector<64x512xf32>
    %c0_4 = arith.constant 0 : index
    %c0_5 = arith.constant 0 : index
    %5 = vector.load %arg4[%c0_4, %c0_5] : memref<1x512xf32, #tpu.memory_space<vmem>>, vector<1x512xf32>
    %6 = vector.broadcast %5 : vector<1x512xf32> to vector<64x512xf32>
    %7 = arith.addf %4, %6 : vector<64x512xf32>
    %8 = arith.truncf %7 : vector<64x512xf32> to vector<64x512xbf16>
    %c0_6 = arith.constant 0 : index
    %c0_7 = arith.constant 0 : index
    %c0_8 = arith.constant 0 : index
    %9 = vector.load %arg5[%c0_6, %c0_7, %c0_8] : memref<1x64x512xbf16, #tpu.memory_space<vmem>>, vector<1x64x512xbf16>
    %10 = vector.shape_cast %9 : vector<1x64x512xbf16> to vector<64x512xbf16>
    %11 = vector.shape_cast %8 : vector<64x512xbf16> to vector<1x64x512xbf16>
    tpu.vector_store %arg5[%c0_6, %c0_7, %c0_8], %11 {strides = array<i32>} : memref<1x64x512xbf16, #tpu.memory_space<vmem>>, vector<1x64x512xbf16>,
    %cst_9 = arith.constant dense<0.000000e+00> : vector<512xf32>
    %12 = vector.multi_reduction <add>, %7, %cst_9 [0] : vector<64x512xf32> to vector<512xf32>
    %13 = vector.shape_cast %12 : vector<512xf32> to vector<1x512xf32>
    %14 = arith.mulf %7, %7 : vector<64x512xf32>
    %cst_10 = arith.constant dense<0.000000e+00> : vector<512xf32>
    %15 = vector.multi_reduction <add>, %14, %cst_10 [0] : vector<64x512xf32> to vector<512xf32>
    %16 = vector.shape_cast %15 : vector<512xf32> to vector<1x512xf32>
    %17 = vector.shape_cast %13 : vector<1x512xf32> to vector<1x512xf32>
    %18 = vector.broadcast %17 : vector<1x512xf32> to vector<8x512xf32>
    %c0_11 = arith.constant 0 : index
    %c0_12 = arith.constant 0 : index
    %19 = vector.load %arg6[%c0_11, %c0_12] : memref<8x512xf32, #tpu.memory_space<vmem>>, vector<8x512xf32>
    tpu.vector_store %arg6[%c0_11, %c0_12], %18 {strides = array<i32>} : memref<8x512xf32, #tpu.memory_space<vmem>>, vector<8x512xf32>,
    %20 = vector.shape_cast %16 : vector<1x512xf32> to vector<1x512xf32>
    %21 = vector.broadcast %20 : vector<1x512xf32> to vector<8x512xf32>
    %c0_13 = arith.constant 0 : index
    %c0_14 = arith.constant 0 : index
    %22 = vector.load %arg7[%c0_13, %c0_14] : memref<8x512xf32, #tpu.memory_space<vmem>>, vector<8x512xf32>
    tpu.vector_store %arg7[%c0_13, %c0_14], %21 {strides = array<i32>} : memref<8x512xf32, #tpu.memory_space<vmem>>, vector<8x512xf32>,
    return
  }
  func.func @transform_0(%arg0: i32, %arg1: i32) -> (i32, i32, i32) {
    %c0_i32 = arith.constant 0 : i32
    %c0_i32_0 = arith.constant 0 : i32
    return %arg0, %c0_i32, %arg1 : i32, i32, i32
  }
  func.func @transform_1(%arg0: i32, %arg1: i32) -> (i32, i32) {
    %c0_i32 = arith.constant 0 : i32
    %c0_i32_0 = arith.constant 0 : i32
    %c0_i32_1 = arith.constant 0 : i32
    return %c0_i32, %c0_i32_0 : i32, i32
  }
  func.func @transform_2(%arg0: i32, %arg1: i32) -> (i32, i32) {
    %c0_i32 = arith.constant 0 : i32
    %c0_i32_0 = arith.constant 0 : i32
    %c0_i32_1 = arith.constant 0 : i32
    return %c0_i32, %c0_i32_0 : i32, i32
  }
  func.func @transform_3(%arg0: i32, %arg1: i32) -> (i32, i32, i32) {
    %c0_i32 = arith.constant 0 : i32
    %c0_i32_0 = arith.constant 0 : i32
    return %arg0, %arg1, %c0_i32 : i32, i32, i32
  }
  func.func @transform_4(%arg0: i32, %arg1: i32) -> (i32, i32) {
    %c1_i32 = arith.constant 1 : i32
    %0 = arith.muli %arg0, %c1_i32 : i32
    %1 = arith.addi %0, %arg1 : i32
    %c0_i32 = arith.constant 0 : i32
    %c0_i32_0 = arith.constant 0 : i32
    return %1, %c0_i32 : i32, i32
  }
  func.func @transform_5(%arg0: i32, %arg1: i32) -> (i32, i32) {
    %c1_i32 = arith.constant 1 : i32
    %0 = arith.muli %arg0, %c1_i32 : i32
    %1 = arith.addi %0, %arg1 : i32
    %c0_i32 = arith.constant 0 : i32
    %c0_i32_0 = arith.constant 0 : i32
    return %1, %c0_i32 : i32, i32
  }
}

</mosaic_0001>

<bundles_post_ra>
// kernel: tpu_custom_call.1
= control target key start
LH: loop header
LB: loop body
LE: loop exit
PB: predicated region body
PF: predicated region fallthrough
CT: control target
= control target key end

     0   :  { %11 = vsyncpa [#allocation3], 0  ;;  %s6169_s0 = inlined_call_operand.vmem [shape: f32[2,1184,64], index: 0, kind: input, shape index: {}]   ;;  %s6170_s1 = inlined_call_operand.vmem [shape: bf16[1184,512], index: 1, kind: input, shape index: {}]   ;;  %s6171_s2 = inlined_call_operand.vmem [shape: f32[1,512], index: 2, kind: input, shape index: {}]   ;;  %s6172_s3 = inlined_call_operand.hbm [shape: bf16[2,64,512], index: 3, kind: output, shape index: {0}]   ;;  %s6173_s4 = inlined_call_operand.hbm [shape: f32[16,512], index: 4, kind: output, shape index: {1}]   ;;  %s6174_s5 = inlined_call_operand.hbm [shape: f32[16,512], index: 5, kind: output, shape index: {2}]  }
   0x1   :  { %13 = vsyncpa [#allocation3 + $0x1], 0 }
   0x2   :  { %14 = vsyncpa [#allocation5], 0 }
   0x3   :  { %16 = vsyncpa [#allocation5 + $0x1], 0  ;;  %s4859_s18 = smov 0   ;;  %s4861_s19 = smov 0  }
   0x4   :  { %s4863_s20 = smov 0   ;;  %s4865_s21 = smov 0  }
   0x5   :  { %s4867_s22 = smov 0   ;;  %s4869_s23 = smov 0  }
   0x6 LB: > { %s3652_s24 = sadd.s32 4294967295, %s4822_s23   ;;  %s3653_s25 = sadd.s32 4294967294, %s4822_s23   ;;  %s4822_s23 = sphi %s4869_s23, %s22_s23   ;;  %s4818_s22 = sphi %s4867_s22, %s6181_s22   ;;  %s4814_s21 = sphi %s4865_s21, %s6180_s21   ;;  %s4810_s20 = sphi %s4863_s20, %s6179_s20   ;;  %s4806_s19 = sphi %s4861_s19, %s6178_s19   ;;  %s4802_s18 = sphi %s4859_s18, %s6177_s18  }
   0x7   : > { %s34_s26 = sadd.s32 1, %s4818_s22  ;;  %s113_s27 = sadd.s32 1, %s4810_s20 }
   0x8   : > { %p36_p0 = scmp.ge.s32.totalorder %s34_s26, 2  ;;  %p123_p1 = scmp.ne.s32.totalorder %s4810_s20, %s4806_s19 }
   0x9   : > { %p124_p2 = scmp.eq.s32.totalorder %s3652_s24, 1  ;;  %p129_p3 = scmp.ne.s32.totalorder %s4806_s19, %s4802_s18 }
   0xa   : > { %s6183_s26 = smov (%p36_p0, %s34_s26), 0  ;;  %p130_p5 = scmp.eq.s32.totalorder %s3653_s25, 1 }
   0xb   : > { %p4901_p4 = por %p124_p2, %p123_p1  ;;  %s108_s29 = ssub.s32 %s4818_s22, %s6183_s26 }
   0xc   : > { %p3656_p6 = scmp.ge.s32.totalorder %s4822_s23, 1  ;;  %p111_p7 = scmp.eq.s32.totalorder %s108_s29, 0 }
   0xd   : > { %p4910_p8 = por %p130_p5, %p129_p3  ;;  %p221_p9 = scmp.lt.s32.totalorder %s4822_s23, 3 }
   0xe   : > { %s4916_s6 = scalar_select %p111_p7, %s4810_s20, %s113_s27  }
   0xf   : > { %p222_p10 = pnand %p3656_p6, %p221_p9 }
  0x10   : > { %p262_p11 = scmp.lt.s32.totalorder (!%p222_p10), %s4814_s21, 1  ;;  %v4240_v0 = vld [vmem:[%s6170_s1 + $0x4] ss:$16 sps:$4 sm:$0xff] (!%p222_p10)   ;;  %v4242_v1 = vld [vmem:[%s6170_s1 + $0xc] ss:$16 sps:$4 sm:$0xff] (!%p222_p10)   ;;  %vm2454_vm0 = vcmask (!%p222_p10), 261120  }
  0x11   : > { %225 = sbr.rel (%p222_p10) target bundleno = 683 (0x2ab), region = 32  ;;  %2467 = vmatprep.subr.bf16.mxu0 (!%p222_p10), %v4240_v0  ;;  %v4244_v2 = vld [vmem:[%s6170_s1] ss:$16 sps:$4 sm:$0xff] (!%p222_p10)   ;;  %v4245_v3 = vld [vmem:[%s6170_s1 + $0x8] ss:$16 sps:$4 sm:$0xff] (!%p222_p10)   ;;  %2832 = vmatprep.subr.bf16.mxu1 (!%p222_p10), %v4242_v1  ;;  %s5977_s8 = sand.u32 (!%p222_p10), 1, %s4806_s19  }
  0x12   : > { %v4246_v4 = vld [vmem:[%s6170_s1 + $0x24] ss:$16 sps:$4 sm:$0xff] (!%p222_p10)   ;;  %2468 = vmatpush1.bf16.msra.mxu0 (!%p222_p10), %v4244_v2  ;;  %2833 = vmatpush1.bf16.msra.mxu1 (!%p222_p10), %v4245_v3  ;;  %v4248_v5 = vld [vmem:[%s6170_s1 + $0x2c] ss:$16 sps:$4 sm:$0xff] (!%p222_p10)   ;;  %v4250_v6 = vld [vmem:[%s6170_s1 + $0x20] ss:$16 sps:$4 sm:$0xff] (!%p222_p10)  }
  0x13   : > { %2469 = vmatprep.subr.bf16.mxu0 (!%p222_p10), %v4246_v4  ;;  %v4251_v7 = vld [vmem:[%s6170_s1 + $0x28] ss:$16 sps:$4 sm:$0xff] (!%p222_p10)   ;;  %2834 = vmatprep.subr.bf16.mxu1 (!%p222_p10), %v4248_v5  ;;  %v4252_v8 = vld [vmem:[%s6170_s1 + $0x44] ss:$16 sps:$4 sm:$0xff] (!%p222_p10)   ;;  %v4254_v33 = vld [vmem:[%s6170_s1 + $0x4c] ss:$16 sps:$4 sm:$0xff] (!%p222_p10)  }
  0x14   : > { %v4256_v37 = vld [vmem:[%s6170_s1 + $0x40] ss:$16 sps:$4 sm:$0xff] (!%p222_p10)   ;;  %v4257_v38 = vld [vmem:[%s6170_s1 + $0x48] ss:$16 sps:$4 sm:$0xff] (!%p222_p10)   ;;  %v4258_v40 = vld [vmem:[%s6170_s1 + $0x64] ss:$16 sps:$4 sm:$0xff] (!%p222_p10)  }
  0x15   : > { %v4260_v41 = vld [vmem:[%s6170_s1 + $0x6c] ss:$16 sps:$4 sm:$0xff] (!%p222_p10)   ;;  %v4262_v42 = vld [vmem:[%s6170_s1 + $0x60] ss:$16 sps:$4 sm:$0xff] (!%p222_p10)   ;;  %v4263_v45 = vld [vmem:[%s6170_s1 + $0x68] ss:$16 sps:$4 sm:$0xff] (!%p222_p10)  }
  0x16   : > { %2470 = vmatpush1.bf16.msra.mxu0 (!%p222_p10), %v4250_v6  ;;  %2835 = vmatpush1.bf16.msra.mxu1 (!%p222_p10), %v4251_v7  ;;  %v4264_v49 = vld [vmem:[%s6170_s1 + $0x84] ss:$16 sps:$4 sm:$0xff] (!%p222_p10)   ;;  %v4266_v51 = vld [vmem:[%s6170_s1 + $0x8c] ss:$16 sps:$4 sm:$0xff] (!%p222_p10)   ;;  %v4268_v52 = vld [vmem:[%s6170_s1 + $0x80] ss:$16 sps:$4 sm:$0xff] (!%p222_p10)  }
  0x17   : > { %2471 = vmatprep.subr.bf16.mxu0 (!%p222_p10), %v4252_v8  ;;  %2836 = vmatprep.subr.bf16.mxu1 (!%p222_p10), %v4254_v33  ;;  %v4269_v53 = vld [vmem:[%s6170_s1 + $0x88] ss:$16 sps:$4 sm:$0xff] (!%p222_p10)   ;;  %v4270_v54 = vld [vmem:[%s6170_s1 + $0xa4] ss:$16 sps:$4 sm:$0xff] (!%p222_p10)   ;;  %v4272_v56 = vld [vmem:[%s6170_s1 + $0xac] ss:$16 sps:$4 sm:$0xff] (!%p222_p10)  }
  0x18   : > { %s263_s11 = scalar_select %p262_p11, %s4814_s21, 1  ;;  %v4274_v62 = vld [vmem:[%s6170_s1 + $0xa0] ss:$16 sps:$4 sm:$0xff]   ;;  %v4275_v63 = vld [vmem:[%s6170_s1 + $0xa8] ss:$16 sps:$4 sm:$0xff]  }
  0x19   : > { %v4276_v1 = vld [vmem:[%s6170_s1 + $0xc4] ss:$16 sps:$4 sm:$0xff]   ;;  %v4278_v2 = vld [vmem:[%s6170_s1 + $0xcc] ss:$16 sps:$4 sm:$0xff]   ;;  %v4280_v8 = vld [vmem:[%s6170_s1 + $0xc0] ss:$16 sps:$4 sm:$0xff]  }
  0x1a   : > { %s4171_s27 = smul.u32 1184, %s263_s11  ;;  %2472 = vmatpush1.bf16.msra.mxu0 %v4256_v37  ;;  %2837 = vmatpush1.bf16.msra.mxu1 %v4257_v38  ;;  %v4298_v38 = vld [vmem:[%s6170_s1 + $0x120] ss:$16 sps:$4 sm:$0xff]   ;;  %s3657_s9 = sshll.u32 %s5977_s8, 7 }
  0x1b   : > { %2473 = vmatprep.subr.bf16.mxu0 %v4258_v40  ;;  %2838 = vmatprep.subr.bf16.mxu1 %v4260_v41  ;;  %v4300_v41 = vld [vmem:[%s6170_s1 + $0x144] ss:$16 sps:$4 sm:$0xff]   ;;  %s5990_s10 = scalar_lea.vmem [#allocation2], %s3657_s9  ;;  %s4008_s12 = sshll.u32 %s4814_s21, 11 }
  0x1c   : > { %s4947_s15 = scalar_lea.vmem %s6169_s0, %s4171_s27  ;;  %s3480_s13 = sshll.u32 %s5990_s10, 4  ;;  %s6039_s13 = int_to_ptr.vmem [resolvable:$true] %s3480_s13 }
  0x1d   : > { %v290_v9 = vld [vmem:[%s4947_s15 + $0x80] sm:$0xff]  ;;  %v291_v10 = vld [vmem:[%s4947_s15 + $0x88] sm:$0xff]  ;;  %v292_v14 = vld [vmem:[%s4947_s15 + $0x90] sm:$0xff]  ;;  %s6037_s16 = scalar_lea.hbm %s6172_s3, %s4008_s12  ;;  %s3454_s17 = scalar_lea.sflag [#allocation3], %s5977_s8 }
  0x1e   : > { %v274_v11 = vld [vmem:[%s4947_s15] sm:$0xff]  ;;  %v430_v12 = vpack.c.bf16 %v291_v10, %v290_v9  ;;  %v275_v13 = vld [vmem:[%s4947_s15 + $0x8] sm:$0xff]  ;;  %v293_v15 = vld [vmem:[%s4947_s15 + $0x98] sm:$0xff]  ;;  %2474 = vmatpush1.bf16.msra.mxu0 %v4262_v42  ;;  %2839 = vmatpush1.bf16.msra.mxu1 %v4263_v45  ;;  %s4684_s27 = scalar_lea.vmem %s6039_s13, 2048  ;;  %s4824_s29 = smov [#allocation2]  }
  0x1f   : > { %v422_v16 = vpack.c.bf16 %v275_v13, %v274_v11  ;;  %v276_v17 = vld [vmem:[%s4947_s15 + $0x10] sm:$0xff]  ;;  %v277_v18 = vld [vmem:[%s4947_s15 + $0x18] sm:$0xff]  ;;  %v431_v19 = vpack.c.bf16 %v293_v15, %v292_v14  ;;  %v294_v21 = vld [vmem:[%s4947_s15 + $0xa0] sm:$0xff]  ;;  %2475 = vmatprep.subr.bf16.mxu0 %v4264_v49  ;;  %2840 = vmatprep.subr.bf16.mxu1 %v4266_v51  ;;  %p4685_p12 = scmp.ne.s32.totalorder %s6039_s13, %s4684_s27 }
  0x20   : > { %830 = vxpose.xlu0.c.b16.start [1/8] (narrow) %v430_v12, 64  ;;  %v423_v20 = vpack.c.bf16 %v277_v18, %v276_v17  ;;  %v295_v22 = vld [vmem:[%s4947_s15 + $0xa8] sm:$0xff]  ;;  %v278_v23 = vld [vmem:[%s4947_s15 + $0x20] sm:$0xff]  ;;  %v296_v27 = vld [vmem:[%s4947_s15 + $0xb0] sm:$0xff] }
  0x21   : > { %814 = vxpose.xlu1.c.b16.start [1/8] (narrow) %v422_v16, 64  ;;  %v279_v24 = vld [vmem:[%s4947_s15 + $0x28] sm:$0xff]  ;;  %v432_v25 = vpack.c.bf16 %v295_v22, %v294_v21  ;;  %v297_v28 = vld [vmem:[%s4947_s15 + $0xb8] sm:$0xff]  ;;  %v280_v29 = vld [vmem:[%s4947_s15 + $0x30] sm:$0xff]  ;;  %p4686_p13 = pnand %p4685_p12, %p4901_p4 }
  0x22   : > { %v424_v26 = vpack.c.bf16 %v279_v24, %v278_v23  ;;  %v281_v30 = vld [vmem:[%s4947_s15 + $0x38] sm:$0xff]  ;;  %v298_v31 = vld [vmem:[%s4947_s15 + $0xc0] sm:$0xff]  ;;  %v299_v32 = vld [vmem:[%s4947_s15 + $0xc8] sm:$0xff]  ;;  %v433_v34 = vpack.c.bf16 %v297_v28, %v296_v27  ;;  %2476 = vmatpush1.bf16.msra.mxu0 %v4268_v52  ;;  %2841 = vmatpush1.bf16.msra.mxu1 %v4269_v53 }
  0x23   : > { %v282_v35 = vld [vmem:[%s4947_s15 + $0x40] sm:$0xff]  ;;  %v283_v36 = vld [vmem:[%s4947_s15 + $0x48] sm:$0xff]  ;;  %v425_v39 = vpack.c.bf16 %v281_v30, %v280_v29  ;;  %v300_v43 = vld [vmem:[%s4947_s15 + $0xd0] sm:$0xff]  ;;  %v434_v46 = vpack.c.bf16 %v299_v32, %v298_v31  ;;  %2477 = vmatprep.subr.bf16.mxu0 %v4270_v54  ;;  %2842 = vmatprep.subr.bf16.mxu1 %v4272_v56  ;;  %p4687_p0 = pneg %p4686_p13 }
  0x24   : > { %831 = vxpose.xlu0.c.b16.cont [2/8] (narrow) %v431_v19, 64  ;;  %v301_v44 = vld [vmem:[%s4947_s15 + $0xd8] sm:$0xff]  ;;  %v284_v47 = vld [vmem:[%s4947_s15 + $0x50] sm:$0xff]  ;;  %v426_v50 = vpack.c.bf16 %v283_v36, %v282_v35  ;;  %v302_v55 = vld [vmem:[%s4947_s15 + $0xe0] sm:$0xff] }
  0x25   : > { %815 = vxpose.xlu1.c.b16.cont [2/8] (narrow) %v423_v20, 64  ;;  %v285_v48 = vld [vmem:[%s4947_s15 + $0x58] sm:$0xff]  ;;  %v435_v57 = vpack.c.bf16 %v301_v44, %v300_v43  ;;  %v303_v58 = vld [vmem:[%s4947_s15 + $0xe8] sm:$0xff]  ;;  %v286_v59 = vld [vmem:[%s4947_s15 + $0x60] sm:$0xff] }
  0x26   : > { %v427_v60 = vpack.c.bf16 %v285_v48, %v284_v47  ;;  %v287_v61 = vld [vmem:[%s4947_s15 + $0x68] sm:$0xff]  ;;  %v304_v0 = vld [vmem:[%s4947_s15 + $0xf0] sm:$0xff]  ;;  %v436_v3 = vpack.c.bf16 %v303_v58, %v302_v55  ;;  %v305_v4 = vld [vmem:[%s4947_s15 + $0xf8] sm:$0xff]  ;;  %2478 = vmatpush1.bf16.msra.mxu0 %v4274_v62  ;;  %2843 = vmatpush1.bf16.msra.mxu1 %v4275_v63 }
  0x27   : > { %v288_v5 = vld [vmem:[%s4947_s15 + $0x70] sm:$0xff]  ;;  %v428_v6 = vpack.c.bf16 %v287_v61, %v286_v59  ;;  %v289_v7 = vld [vmem:[%s4947_s15 + $0x78] sm:$0xff]  ;;  %2479 = vmatprep.subr.bf16.mxu0 %v4276_v1  ;;  %2844 = vmatprep.subr.bf16.mxu1 %v4278_v2  ;;  %v322_v10 = vld [vmem:[%s4947_s15 + $0x180] sm:$0xff]  ;;  %v437_v13 = vpack.c.bf16 %v305_v4, %v304_v0 }
  0x28   : > { %832 = vxpose.xlu0.c.b16.cont [3/8] (narrow) %v432_v25, 64  ;;  %v4281_v9 = vld [vmem:[%s6170_s1 + $0xc8] ss:$16 sps:$4 sm:$0xff]   ;;  %v4282_v11 = vld [vmem:[%s6170_s1 + $0xe4] ss:$16 sps:$4 sm:$0xff]   ;;  %v429_v16 = vpack.c.bf16 %v289_v7, %v288_v5 }
  0x29   : > { %816 = vxpose.xlu1.c.b16.cont [3/8] (narrow) %v424_v26, 64  ;;  %v4284_v12 = vld [vmem:[%s6170_s1 + $0xec] ss:$16 sps:$4 sm:$0xff]   ;;  %v306_v15 = vld [vmem:[%s4947_s15 + $0x100] sm:$0xff]  ;;  %v4287_v19 = vld [vmem:[%s6170_s1 + $0xe8] ss:$16 sps:$4 sm:$0xff]  }
  0x2a   : > { %v323_v14 = vld [vmem:[%s4947_s15 + $0x188] sm:$0xff]  ;;  %2480 = vmatpush1.bf16.msra.mxu0 %v4280_v8  ;;  %2845 = vmatpush1.bf16.msra.mxu1 %v4281_v9  ;;  %v4286_v18 = vld [vmem:[%s6170_s1 + $0xe0] ss:$16 sps:$4 sm:$0xff]   ;;  %v4288_v21 = vld [vmem:[%s6170_s1 + $0x104] ss:$16 sps:$4 sm:$0xff]  }
  0x2b   : > { %v307_v17 = vld [vmem:[%s4947_s15 + $0x108] sm:$0xff]  ;;  %2481 = vmatprep.subr.bf16.mxu0 %v4282_v11  ;;  %2846 = vmatprep.subr.bf16.mxu1 %v4284_v12  ;;  %v324_v20 = vld [vmem:[%s4947_s15 + $0x190] sm:$0xff]  ;;  %v446_v23 = vpack.c.bf16 %v323_v14, %v322_v10  ;;  %v325_v24 = vld [vmem:[%s4947_s15 + $0x198] sm:$0xff] }
  0x2c   : > { %833 = vxpose.xlu0.c.b16.cont [4/8] (narrow) %v433_v34, 64  ;;  %v4290_v22 = vld [vmem:[%s6170_s1 + $0x10c] ss:$16 sps:$4 sm:$0xff]   ;;  %v308_v25 = vld [vmem:[%s4947_s15 + $0x110] sm:$0xff]  ;;  %v438_v26 = vpack.c.bf16 %v307_v17, %v306_v15  ;;  %v4293_v29 = vld [vmem:[%s6170_s1 + $0x108] ss:$16 sps:$4 sm:$0xff]   ;;  %v447_v33 = vpack.c.bf16 %v325_v24, %v324_v20 }
  0x2d   : > { %817 = vxpose.xlu1.c.b16.cont [4/8] (narrow) %v425_v39, 64  ;;  %v309_v27 = vld [vmem:[%s4947_s15 + $0x118] sm:$0xff]  ;;  %v4292_v28 = vld [vmem:[%s6170_s1 + $0x100] ss:$16 sps:$4 sm:$0xff]   ;;  %v4294_v31 = vld [vmem:[%s6170_s1 + $0x124] ss:$16 sps:$4 sm:$0xff]  }
  0x2e   : > { %2482 = vmatpush1.bf16.msra.mxu0 %v4286_v18  ;;  %2847 = vmatpush1.bf16.msra.mxu1 %v4287_v19  ;;  %v326_v30 = vld [vmem:[%s4947_s15 + $0x1a0] sm:$0xff]  ;;  %v4296_v32 = vld [vmem:[%s6170_s1 + $0x12c] ss:$16 sps:$4 sm:$0xff]   ;;  %v439_v36 = vpack.c.bf16 %v309_v27, %v308_v25  ;;  %v4299_v39 = vld [vmem:[%s6170_s1 + $0x128] ss:$16 sps:$4 sm:$0xff]  }
  0x2f   : > { %2483 = vmatprep.subr.bf16.mxu0 %v4288_v21  ;;  %2848 = vmatprep.subr.bf16.mxu1 %v4290_v22  ;;  %v327_v34 = vld [vmem:[%s4947_s15 + $0x1a8] sm:$0xff]  ;;  %v310_v35 = vld [vmem:[%s4947_s15 + $0x120] sm:$0xff]  ;;  %v328_v40 = vld [vmem:[%s4947_s15 + $0x1b0] sm:$0xff] }
  0x30   : > { %834 = vxpose.xlu0.c.b16.cont [5/8] (narrow) %v434_v46, 64  ;;  %v311_v37 = vld [vmem:[%s4947_s15 + $0x128] sm:$0xff]  ;;  %v448_v43 = vpack.c.bf16 %v327_v34, %v326_v30  ;;  %v329_v44 = vld [vmem:[%s4947_s15 + $0x1b8] sm:$0xff]  ;;  %v312_v45 = vld [vmem:[%s4947_s15 + $0x130] sm:$0xff] }
  0x31   : > { %818 = vxpose.xlu1.c.b16.cont [5/8] (narrow) %v426_v50, 64  ;;  %v4302_v42 = vld [vmem:[%s6170_s1 + $0x14c] ss:$16 sps:$4 sm:$0xff]   ;;  %v440_v46 = vpack.c.bf16 %v311_v37, %v310_v35  ;;  %v4304_v48 = vld [vmem:[%s6170_s1 + $0x140] ss:$16 sps:$4 sm:$0xff]   ;;  %v449_v53 = vpack.c.bf16 %v329_v44, %v328_v40 }
  0x32   : > { %2484 = vmatpush1.bf16.msra.mxu0 %v4292_v28  ;;  %2849 = vmatpush1.bf16.msra.mxu1 %v4293_v29  ;;  %v313_v47 = vld [vmem:[%s4947_s15 + $0x138] sm:$0xff]  ;;  %v330_v50 = vld [vmem:[%s4947_s15 + $0x1c0] sm:$0xff]  ;;  %v331_v54 = vld [vmem:[%s4947_s15 + $0x1c8] sm:$0xff] }
  0x33   : > { %2485 = vmatprep.subr.bf16.mxu0 %v4294_v31  ;;  %2850 = vmatprep.subr.bf16.mxu1 %v4296_v32  ;;  %v4305_v49 = vld [vmem:[%s6170_s1 + $0x148] ss:$16 sps:$4 sm:$0xff]   ;;  %v4306_v51 = vld [vmem:[%s6170_s1 + $0x164] ss:$16 sps:$4 sm:$0xff]   ;;  %v4308_v52 = vld [vmem:[%s6170_s1 + $0x16c] ss:$16 sps:$4 sm:$0xff]   ;;  %v441_v56 = vpack.c.bf16 %v313_v47, %v312_v45  ;;  %v450_v63 = vpack.c.bf16 %v331_v54, %v330_v50 }
  0x34   : > { %835 = vxpose.xlu0.c.b16.cont [6/8] (narrow) %v435_v57, 64  ;;  %v314_v55 = vld [vmem:[%s4947_s15 + $0x140] sm:$0xff]  ;;  %v315_v57 = vld [vmem:[%s4947_s15 + $0x148] sm:$0xff]  ;;  %v333_v0 = vld [vmem:[%s4947_s15 + $0x1d8] sm:$0xff] }
  0x35   : > { %819 = vxpose.xlu1.c.b16.cont [6/8] (narrow) %v427_v60, 64  ;;  %v4310_v58 = vld [vmem:[%s6170_s1 + $0x160] ss:$16 sps:$4 sm:$0xff]   ;;  %v4311_v59 = vld [vmem:[%s6170_s1 + $0x168] ss:$16 sps:$4 sm:$0xff]   ;;  %v442_v2 = vpack.c.bf16 %v315_v57, %v314_v55 }
  0x36   : > { %2486 = vmatpush1.bf16.msra.mxu0 %v4298_v38  ;;  %2851 = vmatpush1.bf16.msra.mxu1 %v4299_v39  ;;  %v332_v60 = vld [vmem:[%s4947_s15 + $0x1d0] sm:$0xff]  ;;  %v4314_v62 = vld [vmem:[%s6170_s1 + $0x18c] ss:$16 sps:$4 sm:$0xff]   ;;  %v4317_v5 = vld [vmem:[%s6170_s1 + $0x188] ss:$16 sps:$4 sm:$0xff]  }
  0x37   : > { %2487 = vmatprep.subr.bf16.mxu0 %v4300_v41  ;;  %2852 = vmatprep.subr.bf16.mxu1 %v4302_v42  ;;  %v4312_v61 = vld [vmem:[%s6170_s1 + $0x184] ss:$16 sps:$4 sm:$0xff]   ;;  %v4316_v4 = vld [vmem:[%s6170_s1 + $0x180] ss:$16 sps:$4 sm:$0xff]   ;;  %v335_v7 = vld [vmem:[%s4947_s15 + $0x1e8] sm:$0xff]  ;;  %v451_v10 = vpack.c.bf16 %v333_v0, %v332_v60 }
  0x38   : > { %836 = vxpose.xlu0.c.b16.cont [7/8] (narrow) %v436_v3, 64  ;;  %v316_v1 = vld [vmem:[%s4947_s15 + $0x150] sm:$0xff]  ;;  %v317_v3 = vld [vmem:[%s4947_s15 + $0x158] sm:$0xff]  ;;  %v318_v11 = vld [vmem:[%s4947_s15 + $0x160] sm:$0xff] }
  0x39   : > { %820 = vxpose.xlu1.c.b16.cont [7/8] (narrow) %v428_v6, 64  ;;  %v334_v6 = vld [vmem:[%s4947_s15 + $0x1e0] sm:$0xff]  ;;  %v4320_v9 = vld [vmem:[%s6170_s1 + $0x1ac] ss:$16 sps:$4 sm:$0xff]   ;;  %v4323_v15 = vld [vmem:[%s6170_s1 + $0x1a8] ss:$16 sps:$4 sm:$0xff]  }
  0x3a   : > { %2488 = vmatpush1.bf16.msra.mxu0 %v4304_v48  ;;  %2853 = vmatpush1.bf16.msra.mxu1 %v4305_v49  ;;  %v4318_v8 = vld [vmem:[%s6170_s1 + $0x1a4] ss:$16 sps:$4 sm:$0xff]   ;;  %v319_v12 = vld [vmem:[%s4947_s15 + $0x168] sm:$0xff]  ;;  %v4322_v14 = vld [vmem:[%s6170_s1 + $0x1a0] ss:$16 sps:$4 sm:$0xff]   ;;  %v452_v20 = vpack.c.bf16 %v335_v7, %v334_v6 }
  0x3b   : > { %2489 = vmatprep.subr.bf16.mxu0 %v4306_v51  ;;  %2854 = vmatprep.subr.bf16.mxu1 %v4308_v52  ;;  %v336_v17 = vld [vmem:[%s4947_s15 + $0x1f0] sm:$0xff]  ;;  %v337_v18 = vld [vmem:[%s4947_s15 + $0x1f8] sm:$0xff]  ;;  %v444_v22 = vpack.c.bf16 %v319_v12, %v318_v11  ;;  %v354_v34 = vld [vmem:[%s4947_s15 + $0x280] sm:$0xff] }
  0x3c   : > { %837 = vxpose.xlu0.c.b16.end [8/8] (narrow) %v437_v13, 64  ;;  %v443_v13 = vpack.c.bf16 %v317_v3, %v316_v1  ;;  %v4326_v19 = vld [vmem:[%s6170_s1 + $0x1cc] ss:$16 sps:$4 sm:$0xff]   ;;  %v320_v21 = vld [vmem:[%s4947_s15 + $0x170] sm:$0xff]  ;;  %v4329_v25 = vld [vmem:[%s6170_s1 + $0x1c8] ss:$16 sps:$4 sm:$0xff]   ;;  %v453_v28 = vpack.c.bf16 %v337_v18, %v336_v17 }
  0x3d   : > { %821 = vxpose.xlu1.c.b16.end [8/8] (narrow) %v429_v16, 64  ;;  %v4324_v16 = vld [vmem:[%s6170_s1 + $0x1c4] ss:$16 sps:$4 sm:$0xff]   ;;  %v4328_v24 = vld [vmem:[%s6170_s1 + $0x1c0] ss:$16 sps:$4 sm:$0xff]   ;;  %v355_v35 = vld [vmem:[%s4947_s15 + $0x288] sm:$0xff] }
  0x3e   : > { %2490 = vmatpush1.bf16.msra.mxu0 %v4310_v58  ;;  %2855 = vmatpush1.bf16.msra.mxu1 %v4311_v59  ;;  %v4332_v27 = vld [vmem:[%s6170_s1 + $0x1ec] ss:$16 sps:$4 sm:$0xff]   ;;  %v4334_v30 = vld [vmem:[%s6170_s1 + $0x1e0] ss:$16 sps:$4 sm:$0xff]   ;;  %v4335_v31 = vld [vmem:[%s6170_s1 + $0x1e8] ss:$16 sps:$4 sm:$0xff]   ;;  %v462_v38 = vpack.c.bf16 %v355_v35, %v354_v34 }
  0x3f   : > { %2491 = vmatprep.subr.bf16.mxu0 %v4312_v61  ;;  %2856 = vmatprep.subr.bf16.mxu1 %v4314_v62  ;;  %v4338_v32 = vld [vmem:[%s6170_s1 + $0x204] ss:$16 sps:$4 sm:$0xff]   ;;  %v339_v37 = vld [vmem:[%s4947_s15 + $0x208] sm:$0xff]  ;;  %v357_v41 = vld [vmem:[%s4947_s15 + $0x298] sm:$0xff] }
  0x40   : > { %862 = vxpose.xlu0.c.b16.start [1/8] (narrow) %v446_v23, 64  ;;  %v321_v23 = vld [vmem:[%s4947_s15 + $0x178] sm:$0xff]  ;;  %v356_v40 = vld [vmem:[%s4947_s15 + $0x290] sm:$0xff]  ;;  %v359_v47 = vld [vmem:[%s4947_s15 + $0x2a8] sm:$0xff] }
  0x41   : > { %846 = vxpose.xlu1.c.b16.start [1/8] (narrow) %v438_v26, 64  ;;  %v4330_v26 = vld [vmem:[%s6170_s1 + $0x1e4] ss:$16 sps:$4 sm:$0xff]   ;;  %v445_v29 = vpack.c.bf16 %v321_v23, %v320_v21  ;;  %v341_v44 = vld [vmem:[%s4947_s15 + $0x218] sm:$0xff]  ;;  %v343_v50 = vld [vmem:[%s4947_s15 + $0x228] sm:$0xff] }
  0x42   : > { %2492 = vmatpush1.bf16.msra.mxu0 %v4316_v4  ;;  %2857 = vmatpush1.bf16.msra.mxu1 %v4317_v5  ;;  %v340_v42 = vld [vmem:[%s4947_s15 + $0x210] sm:$0xff]  ;;  %v342_v48 = vld [vmem:[%s4947_s15 + $0x220] sm:$0xff]  ;;  %v363_v59 = vld [vmem:[%s4947_s15 + $0x2c8] sm:$0xff] }
  0x43   : > { %2493 = vmatprep.subr.bf16.mxu0 %v4318_v8  ;;  %2858 = vmatprep.subr.bf16.mxu1 %v4320_v9  ;;  %v455_v45 = vpack.c.bf16 %v341_v44, %v340_v42  ;;  %v456_v51 = vpack.c.bf16 %v343_v50, %v342_v48  ;;  %v360_v52 = vld [vmem:[%s4947_s15 + $0x2b0] sm:$0xff]  ;;  %v362_v58 = vld [vmem:[%s4947_s15 + $0x2c0] sm:$0xff]  ;;  %v347_v62 = vld [vmem:[%s4947_s15 + $0x248] sm:$0xff] }
  0x44   : > { %863 = vxpose.xlu0.c.b16.cont [2/8] (narrow) %v447_v33, 64  ;;  %v4341_v33 = vld [vmem:[%s6170_s1 + $0x20c] ss:$16 sps:$4 sm:$0xff]   ;;  %v344_v54 = vld [vmem:[%s4947_s15 + $0x230] sm:$0xff]  ;;  %v346_v60 = vld [vmem:[%s4947_s15 + $0x240] sm:$0xff]  ;;  %v466_v61 = vpack.c.bf16 %v363_v59, %v362_v58 }
  0x45   : > { %847 = vxpose.xlu1.c.b16.cont [2/8] (narrow) %v439_v36, 64  ;;  %v338_v36 = vld [vmem:[%s4947_s15 + $0x200] sm:$0xff]  ;;  %v364_v0 = vld [vmem:[%s4947_s15 + $0x2d0] sm:$0xff]  ;;  %v365_v1 = vld [vmem:[%s4947_s15 + $0x2d8] sm:$0xff] }
  0x46   : > { %2494 = vmatpush1.bf16.msra.mxu0 %v4322_v14  ;;  %2859 = vmatpush1.bf16.msra.mxu1 %v4323_v15  ;;  %v454_v39 = vpack.c.bf16 %v339_v37, %v338_v36  ;;  %v467_v3 = vpack.c.bf16 %v365_v1, %v364_v0  ;;  %v349_v4 = vld [vmem:[%s4947_s15 + $0x258] sm:$0xff]  ;;  %v366_v6 = vld [vmem:[%s4947_s15 + $0x2e0] sm:$0xff]  ;;  %v367_v7 = vld [vmem:[%s4947_s15 + $0x2e8] sm:$0xff] }
  0x47   : > { %2495 = vmatprep.subr.bf16.mxu0 %v4324_v16  ;;  %2860 = vmatprep.subr.bf16.mxu1 %v4326_v19  ;;  %v350_v8 = vld [vmem:[%s4947_s15 + $0x260] sm:$0xff]  ;;  %v468_v9 = vpack.c.bf16 %v367_v7, %v366_v6  ;;  %v4339_v12 = vld [vmem:[%s6170_s1 + $0x208] ss:$16 sps:$4 sm:$0xff]   ;;  %v4347_v15 = vld [vmem:[%s6170_s1 + $0x22c] ss:$16 sps:$4 sm:$0xff]  }
  0x48   : > { %864 = vxpose.xlu0.c.b16.cont [3/8] (narrow) %v448_v43, 64  ;;  %v463_v43 = vpack.c.bf16 %v357_v41, %v356_v40  ;;  %v4336_v11 = vld [vmem:[%s6170_s1 + $0x200] ss:$16 sps:$4 sm:$0xff]   ;;  %v4344_v14 = vld [vmem:[%s6170_s1 + $0x224] ss:$16 sps:$4 sm:$0xff]   ;;  %v369_v17 = vld [vmem:[%s4947_s15 + $0x2f8] sm:$0xff] }
  0x49   : > { %848 = vxpose.xlu1.c.b16.cont [3/8] (narrow) %v440_v46, 64  ;;  %v358_v46 = vld [vmem:[%s4947_s15 + $0x2a0] sm:$0xff]  ;;  %v368_v16 = vld [vmem:[%s4947_s15 + $0x2f0] sm:$0xff]  ;;  %v4345_v23 = vld [vmem:[%s6170_s1 + $0x228] ss:$16 sps:$4 sm:$0xff]  }
  0x4a   : > { %2496 = vmatpush1.bf16.msra.mxu0 %v4328_v24  ;;  %2861 = vmatpush1.bf16.msra.mxu1 %v4329_v25  ;;  %v464_v49 = vpack.c.bf16 %v359_v47, %v358_v46  ;;  %v352_v18 = vld [vmem:[%s4947_s15 + $0x270] sm:$0xff]  ;;  %v469_v24 = vpack.c.bf16 %v369_v17, %v368_v16  ;;  %v4357_v35 = vld [vmem:[%s6170_s1 + $0x268] ss:$16 sps:$4 sm:$0xff]   ;;  %v4377_v48 = vld [vmem:[%s6170_s1 + $0x2cc] ss:$16 sps:$4 sm:$0xff]  }
  0x4b   : > { %2497 = vmatprep.subr.bf16.mxu0 %v4330_v26  ;;  %2862 = vmatprep.subr.bf16.mxu1 %v4332_v27  ;;  %v4350_v26 = vld [vmem:[%s6170_s1 + $0x244] ss:$16 sps:$4 sm:$0xff]   ;;  %v4353_v27 = vld [vmem:[%s6170_s1 + $0x24c] ss:$16 sps:$4 sm:$0xff]   ;;  %v4354_v34 = vld [vmem:[%s6170_s1 + $0x260] ss:$16 sps:$4 sm:$0xff]  }
  0x4c   : > { %865 = vxpose.xlu0.c.b16.cont [4/8] (narrow) %v449_v53, 64  ;;  %v361_v53 = vld [vmem:[%s4947_s15 + $0x2b8] sm:$0xff]  ;;  %v4362_v37 = vld [vmem:[%s6170_s1 + $0x284] ss:$16 sps:$4 sm:$0xff]   ;;  %v4366_v44 = vld [vmem:[%s6170_s1 + $0x2a0] ss:$16 sps:$4 sm:$0xff]  }
  0x4d   : > { %849 = vxpose.xlu1.c.b16.cont [4/8] (narrow) %v441_v56, 64  ;;  %v465_v55 = vpack.c.bf16 %v361_v53, %v360_v52  ;;  %v345_v56 = vld [vmem:[%s4947_s15 + $0x238] sm:$0xff]  ;;  %v4368_v41 = vld [vmem:[%s6170_s1 + $0x2a4] ss:$16 sps:$4 sm:$0xff]   ;;  %v371_v58 = vld [vmem:[%s4947_s15 + $0x308] sm:$0xff] }
  0x4e   : > { %2498 = vmatpush1.bf16.msra.mxu0 %v4334_v30  ;;  %2863 = vmatpush1.bf16.msra.mxu1 %v4335_v31  ;;  %v457_v57 = vpack.c.bf16 %v345_v56, %v344_v54  ;;  %v4351_v30 = vld [vmem:[%s6170_s1 + $0x248] ss:$16 sps:$4 sm:$0xff]   ;;  %v4356_v31 = vld [vmem:[%s6170_s1 + $0x264] ss:$16 sps:$4 sm:$0xff]   ;;  %v4383_v53 = vld [vmem:[%s6170_s1 + $0x2ec] ss:$16 sps:$4 sm:$0xff]  }
  0x4f   : > { %2540 = vmatprep.subr.bf16.mxu0 %v4338_v32  ;;  %2905 = vmatprep.subr.bf16.mxu1 %v4341_v33  ;;  %v4359_v33 = vld [vmem:[%s6170_s1 + $0x26c] ss:$16 sps:$4 sm:$0xff]   ;;  %v4363_v40 = vld [vmem:[%s6170_s1 + $0x288] ss:$16 sps:$4 sm:$0xff]   ;;  %v4374_v47 = vld [vmem:[%s6170_s1 + $0x2c4] ss:$16 sps:$4 sm:$0xff]  }
  0x50   : > { %866 = vxpose.xlu0.c.b16.cont [5/8] (narrow) %v450_v63, 64  ;;  %v458_v63 = vpack.c.bf16 %v347_v62, %v346_v60  ;;  %v4375_v50 = vld [vmem:[%s6170_s1 + $0x2c8] ss:$16 sps:$4 sm:$0xff]   ;;  %v386_v54 = vld [vmem:[%s4947_s15 + $0x380] sm:$0xff]  ;;  %v388_v0 = vld [vmem:[%s4947_s15 + $0x390] sm:$0xff] }
  0x51   : > { %850 = vxpose.xlu1.c.b16.cont [5/8] (narrow) %v442_v2, 64  ;;  %v348_v2 = vld [vmem:[%s4947_s15 + $0x250] sm:$0xff]  ;;  %v4381_v60 = vld [vmem:[%s6170_s1 + $0x2e8] ss:$16 sps:$4 sm:$0xff]  }
  0x52   : > { %v459_v5 = vpack.c.bf16 %v349_v4, %v348_v2  ;;  %v4378_v59 = vld [vmem:[%s6170_s1 + $0x2e0] ss:$16 sps:$4 sm:$0xff]   ;;  %v4386_v62 = vld [vmem:[%s6170_s1 + $0x304] ss:$16 sps:$4 sm:$0xff]   ;;  %v389_v1 = vld [vmem:[%s4947_s15 + $0x398] sm:$0xff] }
  0x53   : > { %v372_v2 = vld [vmem:[%s4947_s15 + $0x310] sm:$0xff]  ;;  %v479_v6 = vpack.c.bf16 %v389_v1, %v388_v0  ;;  %v385_v0 = vld [vmem:[%s4947_s15 + $0x378] sm:$0xff] }
  0x54   : > { %867 = vxpose.xlu0.c.b16.cont [6/8] (narrow) %v451_v10, 64  ;;  %v351_v10 = vld [vmem:[%s4947_s15 + $0x268] sm:$0xff]  ;;  %v4384_v4 = vld [vmem:[%s6170_s1 + $0x300] ss:$16 sps:$4 sm:$0xff]  }
  0x55   : > { %851 = vxpose.xlu1.c.b16.cont [6/8] (narrow) %v443_v13, 64  ;;  %v460_v13 = vpack.c.bf16 %v351_v10, %v350_v8  ;;  %v4392_v8 = vld [vmem:[%s6170_s1 + $0x324] ss:$16 sps:$4 sm:$0xff]   ;;  %v4420_v1 = vld [vmem:[%s6170_s1 + $0x3c0] ss:$16 sps:$4 sm:$0xff]  }
  0x58   : > { %868 = vxpose.xlu0.c.b16.cont [7/8] (narrow) %v452_v20, 64  ;;  %v353_v20 = vld [vmem:[%s4947_s15 + $0x278] sm:$0xff] }
  0x59   : > { %852 = vxpose.xlu1.c.b16.cont [7/8] (narrow) %v444_v22, 64  ;;  %v4342_v22 = vld [vmem:[%s6170_s1 + $0x220] ss:$16 sps:$4 sm:$0xff]   ;;  %v461_v25 = vpack.c.bf16 %v353_v20, %v352_v18  ;;  %v4393_v18 = vld [vmem:[%s6170_s1 + $0x328] ss:$16 sps:$4 sm:$0xff]  }
  0x5a   : > { %v4401_v20 = vld [vmem:[%s6170_s1 + $0x34c] ss:$16 sps:$4 sm:$0xff]  }
  0x5c   : > { %869 = vxpose.xlu0.c.b16.end [8/8] (narrow) %v453_v28, 64 }
  0x5d   : > { %853 = vxpose.xlu1.c.b16.end [8/8] (narrow) %v445_v29, 64  ;;  %v4348_v29 = vld [vmem:[%s6170_s1 + $0x240] ss:$16 sps:$4 sm:$0xff]  }
  0x60   : > { %894 = vxpose.xlu0.c.b16.start [1/8] (narrow) %v462_v38, 64  ;;  %v4365_v38 = vld [vmem:[%s6170_s1 + $0x28c] ss:$16 sps:$4 sm:$0xff]  }
  0x61   : > { %878 = vxpose.xlu1.c.b16.start [1/8] (narrow) %v454_v39, 64  ;;  %v4360_v39 = vld [vmem:[%s6170_s1 + $0x280] ss:$16 sps:$4 sm:$0xff]  }
  0x64   : > { %895 = vxpose.xlu0.c.b16.cont [2/8] (narrow) %v463_v43, 64  ;;  %v4371_v43 = vld [vmem:[%s6170_s1 + $0x2ac] ss:$16 sps:$4 sm:$0xff]  }
  0x65   : > { %879 = vxpose.xlu1.c.b16.cont [2/8] (narrow) %v455_v45, 64  ;;  %v4369_v45 = vld [vmem:[%s6170_s1 + $0x2a8] ss:$16 sps:$4 sm:$0xff]  }
  0x68   : > { %896 = vxpose.xlu0.c.b16.cont [3/8] (narrow) %v464_v49, 64  ;;  %v4372_v49 = vld [vmem:[%s6170_s1 + $0x2c0] ss:$16 sps:$4 sm:$0xff]  }
  0x69   : > { %880 = vxpose.xlu1.c.b16.cont [3/8] (narrow) %v456_v51, 64  ;;  %v4380_v51 = vld [vmem:[%s6170_s1 + $0x2e4] ss:$16 sps:$4 sm:$0xff]  }
  0x6c   : > { %897 = vxpose.xlu0.c.b16.cont [4/8] (narrow) %v465_v55, 64  ;;  %v387_v55 = vld [vmem:[%s4947_s15 + $0x388] sm:$0xff] }
  0x6d   : > { %881 = vxpose.xlu1.c.b16.cont [4/8] (narrow) %v457_v57, 64  ;;  %v478_v56 = vpack.c.bf16 %v387_v55, %v386_v54  ;;  %v370_v57 = vld [vmem:[%s4947_s15 + $0x300] sm:$0xff]  ;;  %v383_v54 = vld [vmem:[%s4947_s15 + $0x368] sm:$0xff] }
  0x6e   : > { %v4414_v55 = vld [vmem:[%s6170_s1 + $0x3a0] ss:$16 sps:$4 sm:$0xff]  }
  0x70   : > { %898 = vxpose.xlu0.c.b16.cont [5/8] (narrow) %v466_v61, 64  ;;  %v470_v61 = vpack.c.bf16 %v371_v58, %v370_v57  ;;  %v4417_v58 = vld [vmem:[%s6170_s1 + $0x3a8] ss:$16 sps:$4 sm:$0xff]  }
  0x71   : > { %882 = vxpose.xlu1.c.b16.cont [5/8] (narrow) %v458_v63, 64  ;;  %v4389_v63 = vld [vmem:[%s6170_s1 + $0x30c] ss:$16 sps:$4 sm:$0xff]  }
  0x74   : > { %899 = vxpose.xlu0.c.b16.cont [6/8] (narrow) %v467_v3, 64  ;;  %v373_v3 = vld [vmem:[%s4947_s15 + $0x318] sm:$0xff] }
  0x75   : > { %883 = vxpose.xlu1.c.b16.cont [6/8] (narrow) %v459_v5, 64  ;;  %v4387_v5 = vld [vmem:[%s6170_s1 + $0x308] ss:$16 sps:$4 sm:$0xff]   ;;  %v471_v7 = vpack.c.bf16 %v373_v3, %v372_v2 }
  0x78   : > { %900 = vxpose.xlu0.c.b16.cont [7/8] (narrow) %v468_v9, 64  ;;  %v4395_v9 = vld [vmem:[%s6170_s1 + $0x32c] ss:$16 sps:$4 sm:$0xff]  }
  0x79   : > { %884 = vxpose.xlu1.c.b16.cont [7/8] (narrow) %v460_v13, 64  ;;  %v374_v13 = vld [vmem:[%s4947_s15 + $0x320] sm:$0xff] }
  0x7c   : > { %901 = vxpose.xlu0.c.b16.end [8/8] (narrow) %v469_v24, 64  ;;  %v377_v24 = vld [vmem:[%s4947_s15 + $0x338] sm:$0xff] }
  0x7d   : > { %885 = vxpose.xlu1.c.b16.end [8/8] (narrow) %v461_v25, 64  ;;  %v4396_v25 = vld [vmem:[%s6170_s1 + $0x340] ss:$16 sps:$4 sm:$0xff]  }
  0x80   : > { %926 = vxpose.xlu0.c.b16.start [1/8] (narrow) %v478_v56, 64 }
  0x81   : > { %910 = vxpose.xlu1.c.b16.start [1/8] (narrow) %v470_v61, 64  ;;  %v400_v61 = vld [vmem:[%s4947_s15 + $0x3f0] sm:$0xff] }
  0x84   : > { %927 = vxpose.xlu0.c.b16.cont [2/8] (narrow) %v479_v6, 64  ;;  %v4431_v6 = vld [vmem:[%s6170_s1 + $0x3ec] ss:$16 sps:$4 sm:$0xff]  }
  0x85   : > { %911 = vxpose.xlu1.c.b16.cont [2/8] (narrow) %v471_v7, 64  ;;  %v4426_v7 = vld [vmem:[%s6170_s1 + $0x3e0] ss:$16 sps:$4 sm:$0xff]  }
  0x86   : > { %v838_v19 = vpop.trf.xlu0 }
  0x87   : > { %2499 = vmatprep.mubr.bf16.mxu0 %v838_v19  ;;  %2864 = vmatprep.mubr.bf16.mxu1 %v838_v19  ;;  %v822_v21 = vpop.trf.xlu1  ;;  %v4398_v19 = vld [vmem:[%s6170_s1 + $0x344] ss:$16 sps:$4 sm:$0xff]  }
  0x88   : > { %2500 = vmatmul.mubr.bf16.vlgmr.msra.gmra.mrb[0].mxu0 %v822_v21  ;;  %2865 = vmatmul.mubr.bf16.vlgmr.msra.gmra.mrb[0].mxu1 %v822_v21  ;;  %v392_v21 = vld [vmem:[%s4947_s15 + $0x3b0] sm:$0xff] }
  0x89   : > { %2541 = vmatpush1.bf16.msra.mxu0 %v4336_v11  ;;  %2906 = vmatpush1.bf16.msra.mxu1 %v4339_v12  ;;  %v390_v11 = vld [vmem:[%s4947_s15 + $0x3a0] sm:$0xff]  ;;  %v391_v12 = vld [vmem:[%s4947_s15 + $0x3a8] sm:$0xff] }
  0x8a   : > { %2542 = vmatprep.subr.bf16.mxu0 %v4344_v14  ;;  %2907 = vmatprep.subr.bf16.mxu1 %v4347_v15  ;;  %v839_v28 = vpop.trf.xlu0  ;;  %v375_v14 = vld [vmem:[%s4947_s15 + $0x328] sm:$0xff]  ;;  %v4390_v15 = vld [vmem:[%s6170_s1 + $0x320] ss:$16 sps:$4 sm:$0xff]   ;;  %v480_v16 = vpack.c.bf16 %v391_v12, %v390_v11  ;;  %v4434_v11 = vld [vmem:[%s6170_s1 + $0x404] ss:$16 sps:$4 sm:$0xff]  }
  0x8b   : > { %2509 = vmatprep.mubr.bf16.mxu0 %v839_v28  ;;  %2874 = vmatprep.mubr.bf16.mxu1 %v839_v28  ;;  %v823_v32 = vpop.trf.xlu1  ;;  %v472_v17 = vpack.c.bf16 %v375_v14, %v374_v13  ;;  %v4399_v28 = vld [vmem:[%s6170_s1 + $0x348] ss:$16 sps:$4 sm:$0xff]   ;;  %v4437_v12 = vld [vmem:[%s6170_s1 + $0x40c] ss:$16 sps:$4 sm:$0xff]   ;;  %v4432_v14 = vld [vmem:[%s6170_s1 + $0x400] ss:$16 sps:$4 sm:$0xff]  }
  0x8c   : > { %928 = vxpose.xlu0.c.b16.cont [3/8] (narrow) %v480_v16, 64  ;;  %v402_v16 = vld [vmem:[%s4947_s15 + $0x400] sm:$0xff] }
  0x8d   : > { %2543 = vmatpush1.bf16.msra.mxu0 %v4342_v22  ;;  %2908 = vmatpush1.bf16.msra.mxu1 %v4345_v23  ;;  %v393_v22 = vld [vmem:[%s4947_s15 + $0x3b8] sm:$0xff]  ;;  %v376_v23 = vld [vmem:[%s4947_s15 + $0x330] sm:$0xff] }
  0x8e   : > { %2544 = vmatprep.subr.bf16.mxu0 %v4350_v26  ;;  %2909 = vmatprep.subr.bf16.mxu1 %v4353_v27  ;;  %v840_v36 = vpop.trf.xlu0  ;;  %v481_v26 = vpack.c.bf16 %v393_v22, %v392_v21  ;;  %v473_v27 = vpack.c.bf16 %v377_v24, %v376_v23  ;;  %v421_v21 = vld [vmem:[%s4947_s15 + $0x498] sm:$0xff]  ;;  %v4440_v22 = vld [vmem:[%s6170_s1 + $0x424] ss:$16 sps:$4 sm:$0xff]   ;;  %v4438_v24 = vld [vmem:[%s6170_s1 + $0x420] ss:$16 sps:$4 sm:$0xff]  }
  0x8f   : > { %v824_v42 = vpop.trf.xlu1  ;;  %912 = vxpose.xlu1.c.b16.cont [3/8] (narrow) %v472_v17, 64  ;;  %v403_v17 = vld [vmem:[%s4947_s15 + $0x408] sm:$0xff] }
  0x90   : > { %2510 = vmatmul.mubr.bf16.gmra.mrb[4].mxu0 %v823_v32  ;;  %2875 = vmatmul.mubr.bf16.gmra.mrb[4].mxu1 %v823_v32  ;;  %v395_v32 = vld [vmem:[%s4947_s15 + $0x3c8] sm:$0xff] }
  0x91   : > { %2545 = vmatpush1.bf16.msra.mxu0 %v4348_v29  ;;  %2910 = vmatpush1.bf16.msra.mxu1 %v4351_v30  ;;  %v4404_v29 = vld [vmem:[%s6170_s1 + $0x364] ss:$16 sps:$4 sm:$0xff]   ;;  %v4407_v30 = vld [vmem:[%s6170_s1 + $0x36c] ss:$16 sps:$4 sm:$0xff]  }
  0x92   : > { %2546 = vmatprep.subr.bf16.mxu0 %v4356_v31  ;;  %2911 = vmatprep.subr.bf16.mxu1 %v4359_v33  ;;  %v841_v46 = vpop.trf.xlu0  ;;  %v394_v31 = vld [vmem:[%s4947_s15 + $0x3c0] sm:$0xff]  ;;  %v4443_v23 = vld [vmem:[%s6170_s1 + $0x42c] ss:$16 sps:$4 sm:$0xff]  }
  0x93   : > { %2519 = vmatprep.mubr.bf16.mxu0 %v840_v36  ;;  %2884 = vmatprep.mubr.bf16.mxu1 %v840_v36  ;;  %v825_v52 = vpop.trf.xlu1  ;;  %v378_v33 = vld [vmem:[%s4947_s15 + $0x340] sm:$0xff]  ;;  %v482_v36 = vpack.c.bf16 %v395_v32, %v394_v31  ;;  %v4449_v32 = vld [vmem:[%s6170_s1 + $0x44c] ss:$16 sps:$4 sm:$0xff]  }
  0x94   : > { %929 = vxpose.xlu0.c.b16.cont [4/8] (narrow) %v481_v26, 64  ;;  %913 = vxpose.xlu1.c.b16.cont [4/8] (narrow) %v473_v27, 64 }
  0x95   : > { %2547 = vmatpush1.bf16.msra.mxu0 %v4354_v34  ;;  %2912 = vmatpush1.bf16.msra.mxu1 %v4357_v35  ;;  %v379_v34 = vld [vmem:[%s4947_s15 + $0x348] sm:$0xff]  ;;  %v4402_v35 = vld [vmem:[%s6170_s1 + $0x360] ss:$16 sps:$4 sm:$0xff]  }
  0x96   : > { %2548 = vmatprep.subr.bf16.mxu0 %v4362_v37  ;;  %2913 = vmatprep.subr.bf16.mxu1 %v4365_v38  ;;  %v474_v37 = vpack.c.bf16 %v379_v34, %v378_v33  ;;  %v4405_v38 = vld [vmem:[%s6170_s1 + $0x368] ss:$16 sps:$4 sm:$0xff]   ;;  %v4444_v33 = vld [vmem:[%s6170_s1 + $0x440] ss:$16 sps:$4 sm:$0xff]  }
  0x97   : > { %v4447_v34 = vld [vmem:[%s6170_s1 + $0x448] ss:$16 sps:$4 sm:$0xff]  }
  0x98   : > { %2520 = vmatmul.mubr.bf16.gmra.mrb[8].mxu0 %v824_v42  ;;  %2885 = vmatmul.mubr.bf16.gmra.mrb[8].mxu1 %v824_v42  ;;  %v397_v42 = vld [vmem:[%s4947_s15 + $0x3d8] sm:$0xff] }
  0x99   : > { %2549 = vmatpush1.bf16.msra.mxu0 %v4360_v39  ;;  %2914 = vmatpush1.bf16.msra.mxu1 %v4363_v40  ;;  %v4410_v39 = vld [vmem:[%s6170_s1 + $0x384] ss:$16 sps:$4 sm:$0xff]   ;;  %v4413_v40 = vld [vmem:[%s6170_s1 + $0x38c] ss:$16 sps:$4 sm:$0xff]  }
  0x9a   : > { %2550 = vmatprep.subr.bf16.mxu0 %v4368_v41  ;;  %2915 = vmatprep.subr.bf16.mxu1 %v4371_v43  ;;  %v396_v41 = vld [vmem:[%s4947_s15 + $0x3d0] sm:$0xff] }
  0x9b   : > { %2529 = vmatprep.mubr.bf16.mxu0 %v841_v46  ;;  %2894 = vmatprep.mubr.bf16.mxu1 %v841_v46  ;;  %v380_v43 = vld [vmem:[%s4947_s15 + $0x350] sm:$0xff]  ;;  %v483_v46 = vpack.c.bf16 %v397_v42, %v396_v41 }
  0x9c   : > { %930 = vxpose.xlu0.c.b16.cont [5/8] (narrow) %v482_v36, 64  ;;  %914 = vxpose.xlu1.c.b16.cont [5/8] (narrow) %v474_v37, 64  ;;  %v406_v36 = vld [vmem:[%s4947_s15 + $0x420] sm:$0xff]  ;;  %v407_v37 = vld [vmem:[%s4947_s15 + $0x428] sm:$0xff] }
  0x9d   : > { %2551 = vmatpush1.bf16.msra.mxu0 %v4366_v44  ;;  %2916 = vmatpush1.bf16.msra.mxu1 %v4369_v45  ;;  %v381_v44 = vld [vmem:[%s4947_s15 + $0x358] sm:$0xff]  ;;  %v4408_v45 = vld [vmem:[%s6170_s1 + $0x380] ss:$16 sps:$4 sm:$0xff]   ;;  %v488_v42 = vpack.c.bf16 %v407_v37, %v406_v36 }
  0x9e   : > { %2552 = vmatprep.subr.bf16.mxu0 %v4374_v47  ;;  %2917 = vmatprep.subr.bf16.mxu1 %v4377_v48  ;;  %v475_v47 = vpack.c.bf16 %v381_v44, %v380_v43  ;;  %v4411_v48 = vld [vmem:[%s6170_s1 + $0x388] ss:$16 sps:$4 sm:$0xff]   ;;  %v4458_v44 = vld [vmem:[%s6170_s1 + $0x484] ss:$16 sps:$4 sm:$0xff]   ;;  %v4515_v36 = vld [vmem:[%s6170_s1 + $0x5ac] ss:$16 sps:$4 sm:$0xff]  }
  0x9f   : > { %v4453_v43 = vld [vmem:[%s6170_s1 + $0x468] ss:$16 sps:$4 sm:$0xff]   ;;  %v4510_v37 = vld [vmem:[%s6170_s1 + $0x5a0] ss:$16 sps:$4 sm:$0xff]  }
  0xa0   : > { %2530 = vmatmul.mubr.bf16.gmra.mrb[12].mxu0 %v825_v52  ;;  %2895 = vmatmul.mubr.bf16.gmra.mrb[12].mxu1 %v825_v52  ;;  %v399_v52 = vld [vmem:[%s4947_s15 + $0x3e8] sm:$0xff] }
  0xa1   : > { %2553 = vmatpush1.bf16.msra.mxu0 %v4372_v49  ;;  %2918 = vmatpush1.bf16.msra.mxu1 %v4375_v50  ;;  %v4416_v49 = vld [vmem:[%s6170_s1 + $0x3a4] ss:$16 sps:$4 sm:$0xff]   ;;  %v4419_v50 = vld [vmem:[%s6170_s1 + $0x3ac] ss:$16 sps:$4 sm:$0xff]  }
  0xa2   : > { %2554 = vmatprep.subr.bf16.mxu0 %v4380_v51  ;;  %2919 = vmatprep.subr.bf16.mxu1 %v4383_v53  ;;  %v398_v51 = vld [vmem:[%s4947_s15 + $0x3e0] sm:$0xff] }
  0xa3   : > { %v382_v53 = vld [vmem:[%s4947_s15 + $0x360] sm:$0xff]  ;;  %931 = vxpose.xlu0.c.b16.cont [6/8] (narrow) %v483_v46, 64  ;;  %915 = vxpose.xlu1.c.b16.cont [6/8] (narrow) %v475_v47, 64  ;;  %v484_v56 = vpack.c.bf16 %v399_v52, %v398_v51  ;;  %v4459_v47 = vld [vmem:[%s6170_s1 + $0x488] ss:$16 sps:$4 sm:$0xff]  }
  0xa4   : > { %v476_v57 = vpack.c.bf16 %v383_v54, %v382_v53  ;;  %v4456_v46 = vld [vmem:[%s6170_s1 + $0x480] ss:$16 sps:$4 sm:$0xff]   ;;  %v409_v51 = vld [vmem:[%s4947_s15 + $0x438] sm:$0xff] }
  0xa5   : > { %2555 = vmatpush1.bf16.msra.mxu0 %v4378_v59  ;;  %2920 = vmatpush1.bf16.msra.mxu1 %v4381_v60  ;;  %v4422_v59 = vld [vmem:[%s6170_s1 + $0x3c4] ss:$16 sps:$4 sm:$0xff]   ;;  %v4425_v60 = vld [vmem:[%s6170_s1 + $0x3cc] ss:$16 sps:$4 sm:$0xff]  }
  0xa6   : > { %2556 = vmatprep.subr.bf16.mxu0 %v4386_v62  ;;  %2921 = vmatprep.subr.bf16.mxu1 %v4389_v63  ;;  %v870_v10 = vpop.trf.xlu0  ;;  %v401_v62 = vld [vmem:[%s4947_s15 + $0x3f8] sm:$0xff]  ;;  %v384_v63 = vld [vmem:[%s4947_s15 + $0x370] sm:$0xff] }
  0xa7   : > { %2572 = vmatprep.mubr.bf16.mxu0 %v870_v10  ;;  %2937 = vmatprep.mubr.bf16.mxu1 %v870_v10  ;;  %v485_v2 = vpack.c.bf16 %v401_v62, %v400_v61  ;;  %v477_v3 = vpack.c.bf16 %v385_v0, %v384_v63  ;;  %v419_v10 = vld [vmem:[%s4947_s15 + $0x488] sm:$0xff]  ;;  %v4476_v61 = vld [vmem:[%s6170_s1 + $0x4e4] ss:$16 sps:$4 sm:$0xff]  }
  0xa8   : > { %932 = vxpose.xlu0.c.b16.cont [7/8] (narrow) %v484_v56, 64  ;;  %916 = vxpose.xlu1.c.b16.cont [7/8] (narrow) %v476_v57, 64  ;;  %v4467_v52 = vld [vmem:[%s6170_s1 + $0x4ac] ss:$16 sps:$4 sm:$0xff]   ;;  %v4465_v56 = vld [vmem:[%s6170_s1 + $0x4a8] ss:$16 sps:$4 sm:$0xff]  }
  0xa9   : > { %2557 = vmatpush1.bf16.msra.mxu0 %v4384_v4  ;;  %2922 = vmatpush1.bf16.msra.mxu1 %v4387_v5  ;;  %v4423_v4 = vld [vmem:[%s6170_s1 + $0x3c8] ss:$16 sps:$4 sm:$0xff]   ;;  %v4428_v5 = vld [vmem:[%s6170_s1 + $0x3e4] ss:$16 sps:$4 sm:$0xff]  }
  0xaa   : > { %2558 = vmatprep.subr.bf16.mxu0 %v4392_v8  ;;  %2923 = vmatprep.subr.bf16.mxu1 %v4395_v9  ;;  %v418_v8 = vld [vmem:[%s4947_s15 + $0x480] sm:$0xff]  ;;  %v4429_v9 = vld [vmem:[%s6170_s1 + $0x3e8] ss:$16 sps:$4 sm:$0xff]   ;;  %v871_v26 = vpop.trf.xlu0 }
  0xab   : > { %v494_v13 = vpack.c.bf16 %v419_v10, %v418_v8  ;;  %v4470_v57 = vld [vmem:[%s6170_s1 + $0x4c4] ss:$16 sps:$4 sm:$0xff]   ;;  %v411_v0 = vld [vmem:[%s4947_s15 + $0x448] sm:$0xff]  ;;  %v413_v8 = vld [vmem:[%s4947_s15 + $0x458] sm:$0xff] }
  0xac   : > { %933 = vxpose.xlu0.c.b16.end [8/8] (narrow) %v485_v2, 64  ;;  %917 = vxpose.xlu1.c.b16.end [8/8] (narrow) %v477_v3, 64  ;;  %v410_v62 = vld [vmem:[%s4947_s15 + $0x440] sm:$0xff]  ;;  %v4477_v3 = vld [vmem:[%s6170_s1 + $0x4e8] ss:$16 sps:$4 sm:$0xff]  }
  0xad   : > { %2559 = vmatpush1.bf16.msra.mxu0 %v4390_v15  ;;  %2924 = vmatpush1.bf16.msra.mxu1 %v4393_v18  ;;  %v4435_v15 = vld [vmem:[%s6170_s1 + $0x408] ss:$16 sps:$4 sm:$0xff]   ;;  %v854_v18 = vpop.trf.xlu1  ;;  %v4474_v2 = vld [vmem:[%s6170_s1 + $0x4e0] ss:$16 sps:$4 sm:$0xff]  }
  0xae   : > { %2560 = vmatprep.subr.bf16.mxu0 %v4398_v19  ;;  %2925 = vmatprep.subr.bf16.mxu1 %v4401_v20  ;;  %v486_v19 = vpack.c.bf16 %v403_v17, %v402_v16  ;;  %v420_v20 = vld [vmem:[%s4947_s15 + $0x490] sm:$0xff]  ;;  %v872_v41 = vpop.trf.xlu0  ;;  %v4491_v16 = vld [vmem:[%s6170_s1 + $0x52c] ss:$16 sps:$4 sm:$0xff]  }
  0xaf   : > { %v495_v27 = vpack.c.bf16 %v421_v21, %v420_v20  ;;  %v4480_v10 = vld [vmem:[%s6170_s1 + $0x500] ss:$16 sps:$4 sm:$0xff]  }
  0xb0   : > { %958 = vxpose.xlu0.c.b16.start [1/2] (short) (narrow) %v494_v13, 64  ;;  %942 = vxpose.xlu1.c.b16.start [1/8] (narrow) %v486_v19, 64  ;;  %v4486_v17 = vld [vmem:[%s6170_s1 + $0x520] ss:$16 sps:$4 sm:$0xff]   ;;  %v4494_v19 = vld [vmem:[%s6170_s1 + $0x544] ss:$16 sps:$4 sm:$0xff]  }
  0xb1   : > { %2561 = vmatpush1.bf16.msra.mxu0 %v4396_v25  ;;  %2926 = vmatpush1.bf16.msra.mxu1 %v4399_v28  ;;  %v4441_v25 = vld [vmem:[%s6170_s1 + $0x428] ss:$16 sps:$4 sm:$0xff]   ;;  %v404_v28 = vld [vmem:[%s4947_s15 + $0x410] sm:$0xff] }
  0xb2   : > { %2562 = vmatprep.subr.bf16.mxu0 %v4404_v29  ;;  %2927 = vmatprep.subr.bf16.mxu1 %v4407_v30  ;;  %v405_v29 = vld [vmem:[%s4947_s15 + $0x418] sm:$0xff]  ;;  %v4446_v30 = vld [vmem:[%s6170_s1 + $0x444] ss:$16 sps:$4 sm:$0xff]   ;;  %v873_v53 = vpop.trf.xlu0 }
  0xb3   : > { %v487_v31 = vpack.c.bf16 %v405_v29, %v404_v28  ;;  %v416_v21 = vld [vmem:[%s4947_s15 + $0x470] sm:$0xff]  ;;  %v4503_v28 = vld [vmem:[%s6170_s1 + $0x56c] ss:$16 sps:$4 sm:$0xff]  }
  0xb4   : > { %959 = vxpose.xlu0.c.b16.end [2/2] (short) (narrow) %v495_v27, 64  ;;  %v4500_v27 = vld [vmem:[%s6170_s1 + $0x564] ss:$16 sps:$4 sm:$0xff]   ;;  %v4498_v29 = vld [vmem:[%s6170_s1 + $0x560] ss:$16 sps:$4 sm:$0xff]  }
  0xb5   : > { %2563 = vmatpush1.bf16.msra.mxu0 %v4402_v35  ;;  %2928 = vmatpush1.bf16.msra.mxu1 %v4405_v38  ;;  %v855_v35 = vpop.trf.xlu1  ;;  %v4452_v38 = vld [vmem:[%s6170_s1 + $0x464] ss:$16 sps:$4 sm:$0xff]  }
  0xb6   : > { %2564 = vmatprep.subr.bf16.mxu0 %v4410_v39  ;;  %2929 = vmatprep.subr.bf16.mxu1 %v4413_v40  ;;  %v4455_v39 = vld [vmem:[%s6170_s1 + $0x46c] ss:$16 sps:$4 sm:$0xff]   ;;  %v4450_v40 = vld [vmem:[%s6170_s1 + $0x460] ss:$16 sps:$4 sm:$0xff]  }
  0xb7   : > { %943 = vxpose.xlu1.c.b16.cont [2/8] (narrow) %v487_v31, 64  ;;  %v4506_v31 = vld [vmem:[%s6170_s1 + $0x584] ss:$16 sps:$4 sm:$0xff]  }
  0xb9   : > { %2565 = vmatpush1.bf16.msra.mxu0 %v4408_v45  ;;  %2930 = vmatpush1.bf16.msra.mxu1 %v4411_v48  ;;  %v4461_v45 = vld [vmem:[%s6170_s1 + $0x48c] ss:$16 sps:$4 sm:$0xff]   ;;  %v4464_v48 = vld [vmem:[%s6170_s1 + $0x4a4] ss:$16 sps:$4 sm:$0xff]  }
  0xba   : > { %2566 = vmatprep.subr.bf16.mxu0 %v4416_v49  ;;  %2931 = vmatprep.subr.bf16.mxu1 %v4419_v50  ;;  %v856_v49 = vpop.trf.xlu1  ;;  %v408_v50 = vld [vmem:[%s4947_s15 + $0x430] sm:$0xff] }
  0xbb   : > { %944 = vxpose.xlu1.c.b16.cont [3/8] (narrow) %v488_v42, 64  ;;  %v489_v54 = vpack.c.bf16 %v409_v51, %v408_v50  ;;  %v4519_v42 = vld [vmem:[%s6170_s1 + $0x5c8] ss:$16 sps:$4 sm:$0xff]  }
  0xbc   : > { %v4531_v50 = vld [vmem:[%s6170_s1 + $0x608] ss:$16 sps:$4 sm:$0xff]  }
  0xbd   : > { %2567 = vmatpush1.bf16.msra.mxu0 %v4414_v55  ;;  %2932 = vmatpush1.bf16.msra.mxu1 %v4417_v58  ;;  %v4462_v55 = vld [vmem:[%s6170_s1 + $0x4a0] ss:$16 sps:$4 sm:$0xff]   ;;  %v4473_v58 = vld [vmem:[%s6170_s1 + $0x4cc] ss:$16 sps:$4 sm:$0xff]  }
  0xbe   : > { %2568 = vmatprep.subr.bf16.mxu0 %v4422_v59  ;;  %2933 = vmatprep.subr.bf16.mxu1 %v4425_v60  ;;  %v4468_v59 = vld [vmem:[%s6170_s1 + $0x4c0] ss:$16 sps:$4 sm:$0xff]   ;;  %v4471_v60 = vld [vmem:[%s6170_s1 + $0x4c8] ss:$16 sps:$4 sm:$0xff]   ;;  %v857_v63 = vpop.trf.xlu1 }
  0xbf   : > { %945 = vxpose.xlu1.c.b16.cont [4/8] (narrow) %v489_v54, 64  ;;  %v4534_v54 = vld [vmem:[%s6170_s1 + $0x620] ss:$16 sps:$4 sm:$0xff]  }
  0xc1   : > { %2569 = vmatpush1.bf16.msra.mxu0 %v4420_v1  ;;  %2934 = vmatpush1.bf16.msra.mxu1 %v4423_v4  ;;  %v4479_v1 = vld [vmem:[%s6170_s1 + $0x4ec] ss:$16 sps:$4 sm:$0xff]   ;;  %v4482_v4 = vld [vmem:[%s6170_s1 + $0x504] ss:$16 sps:$4 sm:$0xff]  }
  0xc2   : > { %2570 = vmatprep.subr.bf16.mxu0 %v4428_v5  ;;  %2935 = vmatprep.subr.bf16.mxu1 %v4431_v6  ;;  %v490_v6 = vpack.c.bf16 %v411_v0, %v410_v62  ;;  %v4548_v62 = vld [vmem:[%s6170_s1 + $0x664] ss:$16 sps:$4 sm:$0xff]  }
  0xc4   : > { %946 = vxpose.xlu1.c.b16.cont [5/8] (narrow) %v490_v6, 64  ;;  %v4555_v6 = vld [vmem:[%s6170_s1 + $0x688] ss:$16 sps:$4 sm:$0xff]  }
  0xc5   : > { %2571 = vmatpush1.bf16.msra.mxu0 %v4426_v7  ;;  %2936 = vmatpush1.bf16.msra.mxu1 %v4429_v9  ;;  %v412_v7 = vld [vmem:[%s4947_s15 + $0x450] sm:$0xff]  ;;  %v4485_v9 = vld [vmem:[%s6170_s1 + $0x50c] ss:$16 sps:$4 sm:$0xff]  }
  0xc6   : > { %2613 = vmatprep.subr.bf16.mxu0 %v4434_v11  ;;  %2978 = vmatprep.subr.bf16.mxu1 %v4437_v12  ;;  %v902_v5 = vpop.trf.xlu0  ;;  %v4483_v11 = vld [vmem:[%s6170_s1 + $0x508] ss:$16 sps:$4 sm:$0xff]   ;;  %v4488_v12 = vld [vmem:[%s6170_s1 + $0x524] ss:$16 sps:$4 sm:$0xff]   ;;  %v491_v13 = vpack.c.bf16 %v413_v8, %v412_v7 }
  0xc7   : > { %v886_v51 = vpop.trf.xlu1  ;;  %v4560_v8 = vld [vmem:[%s6170_s1 + $0x6a4] ss:$16 sps:$4 sm:$0xff]  }
  0xc8   : > { %2573 = vmatmul.mubr.bf16.vlgmr.msra.gmra.mrb[0].mxu0 %v854_v18  ;;  %2938 = vmatmul.mubr.bf16.vlgmr.msra.gmra.mrb[0].mxu1 %v854_v18  ;;  %v4489_v18 = vld [vmem:[%s6170_s1 + $0x528] ss:$16 sps:$4 sm:$0xff]  }
  0xc9   : > { %2614 = vmatpush1.bf16.msra.mxu0 %v4432_v14  ;;  %2979 = vmatpush1.bf16.msra.mxu1 %v4435_v15  ;;  %v414_v14 = vld [vmem:[%s4947_s15 + $0x460] sm:$0xff]  ;;  %v415_v15 = vld [vmem:[%s4947_s15 + $0x468] sm:$0xff] }
  0xca   : > { %2615 = vmatprep.subr.bf16.mxu0 %v4440_v22  ;;  %2980 = vmatprep.subr.bf16.mxu1 %v4443_v23  ;;  %v492_v20 = vpack.c.bf16 %v415_v15, %v414_v14  ;;  %v417_v22 = vld [vmem:[%s4947_s15 + $0x478] sm:$0xff]  ;;  %v4564_v15 = vld [vmem:[%s6170_s1 + $0x6c0] ss:$16 sps:$4 sm:$0xff]   ;;  %s4688_s15 = sshll.u32 %s4824_s29, 4  ;;  %s4689_s15 = int_to_ptr.vmem [resolvable:$false] %s4688_s15 }
  0xcb   : > { %2582 = vmatprep.mubr.bf16.mxu0 %v871_v26  ;;  %2947 = vmatprep.mubr.bf16.mxu1 %v871_v26  ;;  %v4497_v23 = vld [vmem:[%s6170_s1 + $0x54c] ss:$16 sps:$4 sm:$0xff]   ;;  %v493_v26 = vpack.c.bf16 %v417_v22, %v416_v21  ;;  %v4570_v21 = vld [vmem:[%s6170_s1 + $0x6e0] ss:$16 sps:$4 sm:$0xff]   ;;  %v4573_v22 = vld [vmem:[%s6170_s1 + $0x6e8] ss:$16 sps:$4 sm:$0xff]   ;;  %p4691_p1 = scmp.lt.s32.totalorder %s6039_s13, %s4689_s15 }
  0xcc   : > { %947 = vxpose.xlu1.c.b16.cont [6/8] (narrow) %v491_v13, 64  ;;  %v4566_v13 = vld [vmem:[%s6170_s1 + $0x6c4] ss:$16 sps:$4 sm:$0xff]   ;;  %v4569_v14 = vld [vmem:[%s6170_s1 + $0x6cc] ss:$16 sps:$4 sm:$0xff]   ;;  %s4690_s7 = scalar_lea.vmem %s4689_s15, 4096 }
  0xcd   : > { %2616 = vmatpush1.bf16.msra.mxu0 %v4438_v24  ;;  %2981 = vmatpush1.bf16.msra.mxu1 %v4441_v25  ;;  %v4492_v24 = vld [vmem:[%s6170_s1 + $0x540] ss:$16 sps:$4 sm:$0xff]   ;;  %v4495_v25 = vld [vmem:[%s6170_s1 + $0x548] ss:$16 sps:$4 sm:$0xff]   ;;  %p4692_p2 = scmp.lt.s32.totalorder %s4690_s7, %s4684_s27 }
  0xce   : > { %2617 = vmatprep.subr.bf16.mxu0 %v4446_v30  ;;  %2982 = vmatprep.subr.bf16.mxu1 %v4449_v32  ;;  %v4501_v30 = vld [vmem:[%s6170_s1 + $0x568] ss:$16 sps:$4 sm:$0xff]   ;;  %v4509_v32 = vld [vmem:[%s6170_s1 + $0x58c] ss:$16 sps:$4 sm:$0xff]  }
  0xcf   : > { %p4693_p3 = por %p4692_p2, %p4691_p1 }
  0xd0   : > { %2583 = vmatmul.mubr.bf16.gmra.mrb[4].mxu0 %v855_v35  ;;  %2948 = vmatmul.mubr.bf16.gmra.mrb[4].mxu1 %v855_v35  ;;  %v4512_v35 = vld [vmem:[%s6170_s1 + $0x5a4] ss:$16 sps:$4 sm:$0xff]  }
  0xd1   : > { %2618 = vmatpush1.bf16.msra.mxu0 %v4444_v33  ;;  %2983 = vmatpush1.bf16.msra.mxu1 %v4447_v34  ;;  %v4504_v33 = vld [vmem:[%s6170_s1 + $0x580] ss:$16 sps:$4 sm:$0xff]   ;;  %v4507_v34 = vld [vmem:[%s6170_s1 + $0x588] ss:$16 sps:$4 sm:$0xff]   ;;  %p4694_p5 = pnand %p4693_p3, %p4687_p0 }
  0xd2   : > { %2619 = vmatprep.subr.bf16.mxu0 %v4452_v38  ;;  %2984 = vmatprep.subr.bf16.mxu1 %v4455_v39  ;;  %v4513_v38 = vld [vmem:[%s6170_s1 + $0x5a8] ss:$16 sps:$4 sm:$0xff]   ;;  %v4518_v39 = vld [vmem:[%s6170_s1 + $0x5c4] ss:$16 sps:$4 sm:$0xff]  }
  0xd3   : > { %2592 = vmatprep.mubr.bf16.mxu0 %v872_v41  ;;  %2957 = vmatprep.mubr.bf16.mxu1 %v872_v41  ;;  %v4516_v41 = vld [vmem:[%s6170_s1 + $0x5c0] ss:$16 sps:$4 sm:$0xff]  }
  0xd4   : > { %948 = vxpose.xlu1.c.b16.cont [7/8] (narrow) %v492_v20, 64 }
  0xd5   : > { %2620 = vmatpush1.bf16.msra.mxu0 %v4450_v40  ;;  %2985 = vmatpush1.bf16.msra.mxu1 %v4453_v43  ;;  %v4521_v40 = vld [vmem:[%s6170_s1 + $0x5cc] ss:$16 sps:$4 sm:$0xff]   ;;  %v4524_v43 = vld [vmem:[%s6170_s1 + $0x5e4] ss:$16 sps:$4 sm:$0xff]  }
  0xd6   : > { %2621 = vmatprep.subr.bf16.mxu0 %v4458_v44  ;;  %2986 = vmatprep.subr.bf16.mxu1 %v4461_v45  ;;  %v4527_v44 = vld [vmem:[%s6170_s1 + $0x5ec] ss:$16 sps:$4 sm:$0xff]   ;;  %v4522_v45 = vld [vmem:[%s6170_s1 + $0x5e0] ss:$16 sps:$4 sm:$0xff]  }
  0xd8   : > { %2593 = vmatmul.mubr.bf16.gmra.mrb[8].mxu0 %v856_v49  ;;  %2958 = vmatmul.mubr.bf16.gmra.mrb[8].mxu1 %v856_v49  ;;  %v4528_v49 = vld [vmem:[%s6170_s1 + $0x600] ss:$16 sps:$4 sm:$0xff]  }
  0xd9   : > { %2622 = vmatpush1.bf16.msra.mxu0 %v4456_v46  ;;  %2987 = vmatpush1.bf16.msra.mxu1 %v4459_v47  ;;  %v4525_v46 = vld [vmem:[%s6170_s1 + $0x5e8] ss:$16 sps:$4 sm:$0xff]   ;;  %v4530_v47 = vld [vmem:[%s6170_s1 + $0x604] ss:$16 sps:$4 sm:$0xff]  }
  0xda   : > { %2623 = vmatprep.subr.bf16.mxu0 %v4464_v48  ;;  %2988 = vmatprep.subr.bf16.mxu1 %v4467_v52  ;;  %v4533_v48 = vld [vmem:[%s6170_s1 + $0x60c] ss:$16 sps:$4 sm:$0xff]   ;;  %v4536_v52 = vld [vmem:[%s6170_s1 + $0x624] ss:$16 sps:$4 sm:$0xff]  }
  0xdb   : > { %2602 = vmatprep.mubr.bf16.mxu0 %v873_v53  ;;  %2967 = vmatprep.mubr.bf16.mxu1 %v873_v53  ;;  %v4539_v53 = vld [vmem:[%s6170_s1 + $0x62c] ss:$16 sps:$4 sm:$0xff]  }
  0xdc   : > { %949 = vxpose.xlu1.c.b16.end [8/8] (narrow) %v493_v26, 64  ;;  %v4579_v26 = vld [vmem:[%s6170_s1 + $0x708] ss:$16 sps:$4 sm:$0xff]  }
  0xdd   : > { %2624 = vmatpush1.bf16.msra.mxu0 %v4462_v55  ;;  %2989 = vmatpush1.bf16.msra.mxu1 %v4465_v56  ;;  %v4537_v55 = vld [vmem:[%s6170_s1 + $0x628] ss:$16 sps:$4 sm:$0xff]   ;;  %v903_v56 = vpop.trf.xlu0 }
  0xde   : > { %2625 = vmatprep.subr.bf16.mxu0 %v4470_v57  ;;  %2990 = vmatprep.subr.bf16.mxu1 %v4473_v58  ;;  %v4542_v57 = vld [vmem:[%s6170_s1 + $0x644] ss:$16 sps:$4 sm:$0xff]   ;;  %v4545_v58 = vld [vmem:[%s6170_s1 + $0x64c] ss:$16 sps:$4 sm:$0xff]  }
  0xe0   : > { %2603 = vmatmul.mubr.bf16.gmra.mrb[12].mxu0 %v857_v63  ;;  %2968 = vmatmul.mubr.bf16.gmra.mrb[12].mxu1 %v857_v63  ;;  %v4551_v63 = vld [vmem:[%s6170_s1 + $0x66c] ss:$16 sps:$4 sm:$0xff]  }
  0xe1   : > { %2626 = vmatpush1.bf16.msra.mxu0 %v4468_v59  ;;  %2991 = vmatpush1.bf16.msra.mxu1 %v4471_v60  ;;  %v4540_v59 = vld [vmem:[%s6170_s1 + $0x640] ss:$16 sps:$4 sm:$0xff]   ;;  %v4543_v60 = vld [vmem:[%s6170_s1 + $0x648] ss:$16 sps:$4 sm:$0xff]   ;;  %v904_v0 = vpop.trf.xlu0 }
  0xe2   : > { %2627 = vmatprep.subr.bf16.mxu0 %v4476_v61  ;;  %2992 = vmatprep.subr.bf16.mxu1 %v4479_v1  ;;  %v887_v61 = vpop.trf.xlu1  ;;  %v4546_v1 = vld [vmem:[%s6170_s1 + $0x660] ss:$16 sps:$4 sm:$0xff]  }
  0xe3   : > { %2645 = vmatprep.mubr.bf16.mxu0 %v902_v5  ;;  %3010 = vmatprep.mubr.bf16.mxu1 %v902_v5  ;;  %v4552_v5 = vld [vmem:[%s6170_s1 + $0x680] ss:$16 sps:$4 sm:$0xff]  }
  0xe5   : > { %2628 = vmatpush1.bf16.msra.mxu0 %v4474_v2  ;;  %2993 = vmatpush1.bf16.msra.mxu1 %v4477_v3  ;;  %v4549_v2 = vld [vmem:[%s6170_s1 + $0x668] ss:$16 sps:$4 sm:$0xff]   ;;  %v4554_v3 = vld [vmem:[%s6170_s1 + $0x684] ss:$16 sps:$4 sm:$0xff]  }
  0xe6   : > { %2629 = vmatprep.subr.bf16.mxu0 %v4482_v4  ;;  %2994 = vmatprep.subr.bf16.mxu1 %v4485_v9  ;;  %v4557_v4 = vld [vmem:[%s6170_s1 + $0x68c] ss:$16 sps:$4 sm:$0xff]   ;;  %v888_v7 = vpop.trf.xlu1 }
  0xe7   : > { %v4563_v9 = vld [vmem:[%s6170_s1 + $0x6ac] ss:$16 sps:$4 sm:$0xff]  }
  0xe9   : > { %2630 = vmatpush1.bf16.msra.mxu0 %v4480_v10  ;;  %2995 = vmatpush1.bf16.msra.mxu1 %v4483_v11  ;;  %v905_v10 = vpop.trf.xlu0  ;;  %v4558_v11 = vld [vmem:[%s6170_s1 + $0x6a0] ss:$16 sps:$4 sm:$0xff]  }
  0xea   : > { %2631 = vmatprep.subr.bf16.mxu0 %v4488_v12  ;;  %2996 = vmatprep.subr.bf16.mxu1 %v4491_v16  ;;  %v4561_v12 = vld [vmem:[%s6170_s1 + $0x6a8] ss:$16 sps:$4 sm:$0xff]  }
  0xeb   : > { %v4567_v16 = vld [vmem:[%s6170_s1 + $0x6c8] ss:$16 sps:$4 sm:$0xff]  }
  0xed   : > { %2632 = vmatpush1.bf16.msra.mxu0 %v4486_v17  ;;  %2997 = vmatpush1.bf16.msra.mxu1 %v4489_v18  ;;  %v889_v17 = vpop.trf.xlu1  ;;  %v4572_v18 = vld [vmem:[%s6170_s1 + $0x6e4] ss:$16 sps:$4 sm:$0xff]  }
  0xee   : > { %2633 = vmatprep.subr.bf16.mxu0 %v4494_v19  ;;  %2998 = vmatprep.subr.bf16.mxu1 %v4497_v23  ;;  %v4575_v19 = vld [vmem:[%s6170_s1 + $0x6ec] ss:$16 sps:$4 sm:$0xff]   ;;  %v4578_v23 = vld [vmem:[%s6170_s1 + $0x704] ss:$16 sps:$4 sm:$0xff]  }
  0xf1   : > { %2634 = vmatpush1.bf16.msra.mxu0 %v4492_v24  ;;  %2999 = vmatpush1.bf16.msra.mxu1 %v4495_v25  ;;  %v4581_v24 = vld [vmem:[%s6170_s1 + $0x70c] ss:$16 sps:$4 sm:$0xff]   ;;  %v4576_v25 = vld [vmem:[%s6170_s1 + $0x700] ss:$16 sps:$4 sm:$0xff]  }
  0xf2   : > { %2635 = vmatprep.subr.bf16.mxu0 %v4500_v27  ;;  %3000 = vmatprep.subr.bf16.mxu1 %v4503_v28  ;;  %v4584_v27 = vld [vmem:[%s6170_s1 + $0x724] ss:$16 sps:$4 sm:$0xff]   ;;  %v4587_v28 = vld [vmem:[%s6170_s1 + $0x72c] ss:$16 sps:$4 sm:$0xff]  }
  0xf5   : > { %2636 = vmatpush1.bf16.msra.mxu0 %v4498_v29  ;;  %3001 = vmatpush1.bf16.msra.mxu1 %v4501_v30  ;;  %v4582_v29 = vld [vmem:[%s6170_s1 + $0x720] ss:$16 sps:$4 sm:$0xff]   ;;  %v4585_v30 = vld [vmem:[%s6170_s1 + $0x728] ss:$16 sps:$4 sm:$0xff]  }
  0xf6   : > { %2637 = vmatprep.subr.bf16.mxu0 %v4506_v31  ;;  %3002 = vmatprep.subr.bf16.mxu1 %v4509_v32  ;;  %v934_v20 = vpop.trf.xlu0  ;;  %v4590_v31 = vld [vmem:[%s6170_s1 + $0x744] ss:$16 sps:$4 sm:$0xff]   ;;  %v4593_v32 = vld [vmem:[%s6170_s1 + $0x74c] ss:$16 sps:$4 sm:$0xff]  }
  0xf9   : > { %2638 = vmatpush1.bf16.msra.mxu0 %v4504_v33  ;;  %3003 = vmatpush1.bf16.msra.mxu1 %v4507_v34  ;;  %v4588_v33 = vld [vmem:[%s6170_s1 + $0x740] ss:$16 sps:$4 sm:$0xff]   ;;  %v4591_v34 = vld [vmem:[%s6170_s1 + $0x748] ss:$16 sps:$4 sm:$0xff]  }
  0xfa   : > { %2639 = vmatprep.subr.bf16.mxu0 %v4512_v35  ;;  %3004 = vmatprep.subr.bf16.mxu1 %v4515_v36  ;;  %v4596_v35 = vld [vmem:[%s6170_s1 + $0x764] ss:$16 sps:$4 sm:$0xff]   ;;  %v4599_v36 = vld [vmem:[%s6170_s1 + $0x76c] ss:$16 sps:$4 sm:$0xff]  }
  0xfd   : > { %2640 = vmatpush1.bf16.msra.mxu0 %v4510_v37  ;;  %3005 = vmatpush1.bf16.msra.mxu1 %v4513_v38  ;;  %v4594_v37 = vld [vmem:[%s6170_s1 + $0x760] ss:$16 sps:$4 sm:$0xff]   ;;  %v4597_v38 = vld [vmem:[%s6170_s1 + $0x768] ss:$16 sps:$4 sm:$0xff]  }
  0xfe   : > { %2641 = vmatprep.subr.bf16.mxu0 %v4518_v39  ;;  %3006 = vmatprep.subr.bf16.mxu1 %v4521_v40  ;;  %v4602_v39 = vld [vmem:[%s6170_s1 + $0x784] ss:$16 sps:$4 sm:$0xff]   ;;  %v4605_v40 = vld [vmem:[%s6170_s1 + $0x78c] ss:$16 sps:$4 sm:$0xff]  }
 0x101   : > { %2642 = vmatpush1.bf16.msra.mxu0 %v4516_v41  ;;  %3007 = vmatpush1.bf16.msra.mxu1 %v4519_v42  ;;  %v4600_v41 = vld [vmem:[%s6170_s1 + $0x780] ss:$16 sps:$4 sm:$0xff]   ;;  %v4603_v42 = vld [vmem:[%s6170_s1 + $0x788] ss:$16 sps:$4 sm:$0xff]  }
 0x102   : > { %2643 = vmatprep.subr.bf16.mxu0 %v4524_v43  ;;  %3008 = vmatprep.subr.bf16.mxu1 %v4527_v44  ;;  %v4608_v43 = vld [vmem:[%s6170_s1 + $0x7a4] ss:$16 sps:$4 sm:$0xff]   ;;  %v4611_v44 = vld [vmem:[%s6170_s1 + $0x7ac] ss:$16 sps:$4 sm:$0xff]  }
 0x105   : > { %2644 = vmatpush1.bf16.msra.mxu0 %v4522_v45  ;;  %3009 = vmatpush1.bf16.msra.mxu1 %v4525_v46  ;;  %v4606_v45 = vld [vmem:[%s6170_s1 + $0x7a0] ss:$16 sps:$4 sm:$0xff]   ;;  %v4609_v46 = vld [vmem:[%s6170_s1 + $0x7a8] ss:$16 sps:$4 sm:$0xff]  }
 0x106   : > { %2686 = vmatprep.subr.bf16.mxu0 %v4530_v47  ;;  %3051 = vmatprep.subr.bf16.mxu1 %v4533_v48  ;;  %v4614_v47 = vld [vmem:[%s6170_s1 + $0x7c4] ss:$16 sps:$4 sm:$0xff]   ;;  %v4617_v48 = vld [vmem:[%s6170_s1 + $0x7cc] ss:$16 sps:$4 sm:$0xff]  }
 0x108   : > { %2646 = vmatmul.mubr.bf16.vlgmr.msra.gmra.mrb[0].mxu0 %v886_v51  ;;  %3011 = vmatmul.mubr.bf16.vlgmr.msra.gmra.mrb[0].mxu1 %v886_v51  ;;  %v4620_v51 = vld [vmem:[%s6170_s1 + $0x7e4] ss:$16 sps:$4 sm:$0xff]  }
 0x109   : > { %2687 = vmatpush1.bf16.msra.mxu0 %v4528_v49  ;;  %3052 = vmatpush1.bf16.msra.mxu1 %v4531_v50  ;;  %v4612_v49 = vld [vmem:[%s6170_s1 + $0x7c0] ss:$16 sps:$4 sm:$0xff]   ;;  %v4615_v50 = vld [vmem:[%s6170_s1 + $0x7c8] ss:$16 sps:$4 sm:$0xff]  }
 0x10a   : > { %2688 = vmatprep.subr.bf16.mxu0 %v4536_v52  ;;  %3053 = vmatprep.subr.bf16.mxu1 %v4539_v53  ;;  %v4623_v52 = vld [vmem:[%s6170_s1 + $0x7ec] ss:$16 sps:$4 sm:$0xff]   ;;  %v4618_v53 = vld [vmem:[%s6170_s1 + $0x7e0] ss:$16 sps:$4 sm:$0xff]  }
 0x10b   : > { %2655 = vmatprep.mubr.bf16.mxu0 %v903_v56  ;;  %3020 = vmatprep.mubr.bf16.mxu1 %v903_v56  ;;  %v4629_v56 = vld [vmem:[%s6170_s1 + $0x80c] ss:$16 sps:$4 sm:$0xff]  }
 0x10d   : > { %2689 = vmatpush1.bf16.msra.mxu0 %v4534_v54  ;;  %3054 = vmatpush1.bf16.msra.mxu1 %v4537_v55  ;;  %v4621_v54 = vld [vmem:[%s6170_s1 + $0x7e8] ss:$16 sps:$4 sm:$0xff]   ;;  %v4626_v55 = vld [vmem:[%s6170_s1 + $0x804] ss:$16 sps:$4 sm:$0xff]  }
 0x10e   : > { %2690 = vmatprep.subr.bf16.mxu0 %v4542_v57  ;;  %3055 = vmatprep.subr.bf16.mxu1 %v4545_v58  ;;  %v4624_v57 = vld [vmem:[%s6170_s1 + $0x800] ss:$16 sps:$4 sm:$0xff]   ;;  %v4627_v58 = vld [vmem:[%s6170_s1 + $0x808] ss:$16 sps:$4 sm:$0xff]  }
 0x110   : > { %2656 = vmatmul.mubr.bf16.gmra.mrb[4].mxu0 %v887_v61  ;;  %3021 = vmatmul.mubr.bf16.gmra.mrb[4].mxu1 %v887_v61  ;;  %v4635_v61 = vld [vmem:[%s6170_s1 + $0x82c] ss:$16 sps:$4 sm:$0xff]  }
 0x111   : > { %2691 = vmatpush1.bf16.msra.mxu0 %v4540_v59  ;;  %3056 = vmatpush1.bf16.msra.mxu1 %v4543_v60  ;;  %v918_v59 = vpop.trf.xlu1  ;;  %v4632_v60 = vld [vmem:[%s6170_s1 + $0x824] ss:$16 sps:$4 sm:$0xff]  }
 0x112   : > { %2692 = vmatprep.subr.bf16.mxu0 %v4548_v62  ;;  %3057 = vmatprep.subr.bf16.mxu1 %v4551_v63  ;;  %v935_v62 = vpop.trf.xlu0  ;;  %v4630_v63 = vld [vmem:[%s6170_s1 + $0x820] ss:$16 sps:$4 sm:$0xff]  }
 0x113   : > { %2665 = vmatprep.mubr.bf16.mxu0 %v904_v0  ;;  %3030 = vmatprep.mubr.bf16.mxu1 %v904_v0  ;;  %v4633_v0 = vld [vmem:[%s6170_s1 + $0x828] ss:$16 sps:$4 sm:$0xff]  }
 0x115   : > { %2693 = vmatpush1.bf16.msra.mxu0 %v4546_v1  ;;  %3058 = vmatpush1.bf16.msra.mxu1 %v4549_v2  ;;  %v4638_v1 = vld [vmem:[%s6170_s1 + $0x844] ss:$16 sps:$4 sm:$0xff]   ;;  %v4641_v2 = vld [vmem:[%s6170_s1 + $0x84c] ss:$16 sps:$4 sm:$0xff]  }
 0x116   : > { %2694 = vmatprep.subr.bf16.mxu0 %v4554_v3  ;;  %3059 = vmatprep.subr.bf16.mxu1 %v4557_v4  ;;  %v4636_v3 = vld [vmem:[%s6170_s1 + $0x840] ss:$16 sps:$4 sm:$0xff]   ;;  %v4639_v4 = vld [vmem:[%s6170_s1 + $0x848] ss:$16 sps:$4 sm:$0xff]  }
 0x118   : > { %2666 = vmatmul.mubr.bf16.gmra.mrb[8].mxu0 %v888_v7  ;;  %3031 = vmatmul.mubr.bf16.gmra.mrb[8].mxu1 %v888_v7  ;;  %v4647_v7 = vld [vmem:[%s6170_s1 + $0x86c] ss:$16 sps:$4 sm:$0xff]  }
 0x119   : > { %2695 = vmatpush1.bf16.msra.mxu0 %v4552_v5  ;;  %3060 = vmatpush1.bf16.msra.mxu1 %v4555_v6  ;;  %v919_v5 = vpop.trf.xlu1  ;;  %v4644_v6 = vld [vmem:[%s6170_s1 + $0x864] ss:$16 sps:$4 sm:$0xff]  }
 0x11a   : > { %2696 = vmatprep.subr.bf16.mxu0 %v4560_v8  ;;  %3061 = vmatprep.subr.bf16.mxu1 %v4563_v9  ;;  %v936_v8 = vpop.trf.xlu0  ;;  %v4642_v9 = vld [vmem:[%s6170_s1 + $0x860] ss:$16 sps:$4 sm:$0xff]  }
 0x11b   : > { %2675 = vmatprep.mubr.bf16.mxu0 %v905_v10  ;;  %3040 = vmatprep.mubr.bf16.mxu1 %v905_v10  ;;  %v4645_v10 = vld [vmem:[%s6170_s1 + $0x868] ss:$16 sps:$4 sm:$0xff]  }
 0x11d   : > { %2697 = vmatpush1.bf16.msra.mxu0 %v4558_v11  ;;  %3062 = vmatpush1.bf16.msra.mxu1 %v4561_v12  ;;  %v4650_v11 = vld [vmem:[%s6170_s1 + $0x884] ss:$16 sps:$4 sm:$0xff]   ;;  %v4653_v12 = vld [vmem:[%s6170_s1 + $0x88c] ss:$16 sps:$4 sm:$0xff]  }
 0x11e   : > { %2698 = vmatprep.subr.bf16.mxu0 %v4566_v13  ;;  %3063 = vmatprep.subr.bf16.mxu1 %v4569_v14  ;;  %v4648_v13 = vld [vmem:[%s6170_s1 + $0x880] ss:$16 sps:$4 sm:$0xff]   ;;  %v4651_v14 = vld [vmem:[%s6170_s1 + $0x888] ss:$16 sps:$4 sm:$0xff]  }
 0x120   : > { %2676 = vmatmul.mubr.bf16.gmra.mrb[12].mxu0 %v889_v17  ;;  %3041 = vmatmul.mubr.bf16.gmra.mrb[12].mxu1 %v889_v17  ;;  %v4659_v17 = vld [vmem:[%s6170_s1 + $0x8ac] ss:$16 sps:$4 sm:$0xff]  }
 0x121   : > { %2699 = vmatpush1.bf16.msra.mxu0 %v4564_v15  ;;  %3064 = vmatpush1.bf16.msra.mxu1 %v4567_v16  ;;  %v920_v15 = vpop.trf.xlu1  ;;  %v4656_v16 = vld [vmem:[%s6170_s1 + $0x8a4] ss:$16 sps:$4 sm:$0xff]  }
 0x122   : > { %2700 = vmatprep.subr.bf16.mxu0 %v4572_v18  ;;  %3065 = vmatprep.subr.bf16.mxu1 %v4575_v19  ;;  %v937_v18 = vpop.trf.xlu0  ;;  %v4654_v19 = vld [vmem:[%s6170_s1 + $0x8a0] ss:$16 sps:$4 sm:$0xff]  }
 0x123   : > { %2718 = vmatprep.mubr.bf16.mxu0 %v934_v20  ;;  %3083 = vmatprep.mubr.bf16.mxu1 %v934_v20  ;;  %v4657_v20 = vld [vmem:[%s6170_s1 + $0x8a8] ss:$16 sps:$4 sm:$0xff]  }
 0x125   : > { %2701 = vmatpush1.bf16.msra.mxu0 %v4570_v21  ;;  %3066 = vmatpush1.bf16.msra.mxu1 %v4573_v22  ;;  %v4662_v21 = vld [vmem:[%s6170_s1 + $0x8c4] ss:$16 sps:$4 sm:$0xff]   ;;  %v4665_v22 = vld [vmem:[%s6170_s1 + $0x8cc] ss:$16 sps:$4 sm:$0xff]  }
 0x126   : > { %2702 = vmatprep.subr.bf16.mxu0 %v4578_v23  ;;  %3067 = vmatprep.subr.bf16.mxu1 %v4581_v24  ;;  %v4660_v23 = vld [vmem:[%s6170_s1 + $0x8c0] ss:$16 sps:$4 sm:$0xff]   ;;  %v4663_v24 = vld [vmem:[%s6170_s1 + $0x8c8] ss:$16 sps:$4 sm:$0xff]  }
 0x129   : > { %2703 = vmatpush1.bf16.msra.mxu0 %v4576_v25  ;;  %3068 = vmatpush1.bf16.msra.mxu1 %v4579_v26  ;;  %v921_v25 = vpop.trf.xlu1  ;;  %v4668_v26 = vld [vmem:[%s6170_s1 + $0x8e4] ss:$16 sps:$4 sm:$0xff]  }
 0x12a   : > { %2704 = vmatprep.subr.bf16.mxu0 %v4584_v27  ;;  %3069 = vmatprep.subr.bf16.mxu1 %v4587_v28  ;;  %v4671_v27 = vld [vmem:[%s6170_s1 + $0x8ec] ss:$16 sps:$4 sm:$0xff]   ;;  %v966_v28 = vpop.trf.xlu0 }
 0x12d   : > { %2705 = vmatpush1.bf16.msra.mxu0 %v4582_v29  ;;  %3070 = vmatpush1.bf16.msra.mxu1 %v4585_v30  ;;  %v4666_v29 = vld [vmem:[%s6170_s1 + $0x8e0] ss:$16 sps:$4 sm:$0xff]   ;;  %v4669_v30 = vld [vmem:[%s6170_s1 + $0x8e8] ss:$16 sps:$4 sm:$0xff]  }
 0x12e   : > { %2706 = vmatprep.subr.bf16.mxu0 %v4590_v31  ;;  %3071 = vmatprep.subr.bf16.mxu1 %v4593_v32  ;;  %v4674_v31 = vld [vmem:[%s6170_s1 + $0x904] ss:$16 sps:$4 sm:$0xff]   ;;  %v4677_v32 = vld [vmem:[%s6170_s1 + $0x90c] ss:$16 sps:$4 sm:$0xff]  }
 0x131   : > { %2707 = vmatpush1.bf16.msra.mxu0 %v4588_v33  ;;  %3072 = vmatpush1.bf16.msra.mxu1 %v4591_v34  ;;  %v4672_v33 = vld [vmem:[%s6170_s1 + $0x900] ss:$16 sps:$4 sm:$0xff]   ;;  %v4675_v34 = vld [vmem:[%s6170_s1 + $0x908] ss:$16 sps:$4 sm:$0xff]  }
 0x132   : > { %2708 = vmatprep.subr.bf16.mxu0 %v4596_v35  ;;  %3073 = vmatprep.subr.bf16.mxu1 %v4599_v36  ;;  %v4680_v35 = vld [vmem:[%s6170_s1 + $0x924] ss:$16 sps:$4 sm:$0xff]   ;;  %v4683_v36 = vld [vmem:[%s6170_s1 + $0x92c] ss:$16 sps:$4 sm:$0xff]  }
 0x135   : > { %2709 = vmatpush1.bf16.msra.mxu0 %v4594_v37  ;;  %3074 = vmatpush1.bf16.msra.mxu1 %v4597_v38  ;;  %v4678_v37 = vld [vmem:[%s6170_s1 + $0x920] ss:$16 sps:$4 sm:$0xff]   ;;  %v4681_v38 = vld [vmem:[%s6170_s1 + $0x928] ss:$16 sps:$4 sm:$0xff]  }
 0x136   : > { %2710 = vmatprep.subr.bf16.mxu0 %v4602_v39  ;;  %3075 = vmatprep.subr.bf16.mxu1 %v4605_v40  ;;  %v950_v39 = vpop.trf.xlu1  ;;  %v967_v40 = vpop.trf.xlu0 }
 0x139   : > { %2711 = vmatpush1.bf16.msra.mxu0 %v4600_v41  ;;  %3076 = vmatpush1.bf16.msra.mxu1 %v4603_v42 }
 0x13a   : > { %2712 = vmatprep.subr.bf16.mxu0 %v4608_v43  ;;  %3077 = vmatprep.subr.bf16.mxu1 %v4611_v44  ;;  %v951_v41 = vpop.trf.xlu1  ;;  %v968_v42 = vpop.trf.xlu0 }
 0x13d   : > { %2713 = vmatpush1.bf16.msra.mxu0 %v4606_v45  ;;  %3078 = vmatpush1.bf16.msra.mxu1 %v4609_v46  ;;  %v794_v46 = vlaneseq }
 0x13e   : > { %2714 = vmatprep.subr.bf16.mxu0 %v4614_v47  ;;  %3079 = vmatprep.subr.bf16.mxu1 %v4617_v48  ;;  %v952_v43 = vpop.trf.xlu1  ;;  %v969_v44 = vpop.trf.xlu0 }
 0x13f   : > { %v795_v47 = vshrl.u32 %v794_v46, 7 }
 0x141   : > { %2715 = vmatpush1.bf16.msra.mxu0 %v4612_v49  ;;  %3080 = vmatpush1.bf16.msra.mxu1 %v4615_v50  ;;  %v796_v48 = vsub.s32 0, %v795_v47  ;;  %v804_v49 = vsub.s32 2, %v795_v47  ;;  %v792_v50 = vld [vmem:[%s6171_s2] sm:$0xf] }
 0x142   : > { %2716 = vmatprep.subr.bf16.mxu0 %v4620_v51  ;;  %3081 = vmatprep.subr.bf16.mxu1 %v4623_v52  ;;  %v953_v45 = vpop.trf.xlu1  ;;  %v800_v51 = vsub.s32 1, %v795_v47  ;;  %v808_v52 = vsub.s32 3, %v795_v47 }
 0x145   : > { %2717 = vmatpush1.bf16.msra.mxu0 %v4618_v53  ;;  %3082 = vmatpush1.bf16.msra.mxu1 %v4621_v54  ;;  %v5972_v53 = vrot.slane %v792_v50, %v796_v48  ;;  %v5974_v54 = vrot.slane %v792_v50, %v804_v49 }
 0x146   : > { %2759 = vmatprep.subr.bf16.mxu0 %v4626_v55  ;;  %3124 = vmatprep.subr.bf16.mxu1 %v4629_v56  ;;  %v5979_v55 = vrot.slane %v792_v50, %v800_v51  ;;  %v5981_v56 = vrot.slane %v792_v50, %v808_v52 }
 0x148   : > { %2719 = vmatmul.mubr.bf16.vlgmr.msra.gmra.mrb[0].mxu0 %v918_v59  ;;  %3084 = vmatmul.mubr.bf16.vlgmr.msra.gmra.mrb[0].mxu1 %v918_v59 }
 0x149   : > { %2760 = vmatpush1.bf16.msra.mxu0 %v4624_v57  ;;  %3125 = vmatpush1.bf16.msra.mxu1 %v4627_v58 }
 0x14a   : > { %2761 = vmatprep.subr.bf16.mxu0 %v4632_v60  ;;  %3126 = vmatprep.subr.bf16.mxu1 %v4635_v61 }
 0x14b   : > { %2728 = vmatprep.mubr.bf16.mxu0 %v935_v62  ;;  %3093 = vmatprep.mubr.bf16.mxu1 %v935_v62 }
 0x14d   : > { %2762 = vmatpush1.bf16.msra.mxu0 %v4630_v63  ;;  %3127 = vmatpush1.bf16.msra.mxu1 %v4633_v0 }
 0x14e   : > { %2763 = vmatprep.subr.bf16.mxu0 %v4638_v1  ;;  %3128 = vmatprep.subr.bf16.mxu1 %v4641_v2 }
 0x150   : > { %2729 = vmatmul.mubr.bf16.gmra.mrb[4].mxu0 %v919_v5  ;;  %3094 = vmatmul.mubr.bf16.gmra.mrb[4].mxu1 %v919_v5 }
 0x151   : > { %2764 = vmatpush1.bf16.msra.mxu0 %v4636_v3  ;;  %3129 = vmatpush1.bf16.msra.mxu1 %v4639_v4 }
 0x152   : > { %2765 = vmatprep.subr.bf16.mxu0 %v4644_v6  ;;  %3130 = vmatprep.subr.bf16.mxu1 %v4647_v7 }
 0x153   : > { %2738 = vmatprep.mubr.bf16.mxu0 %v936_v8  ;;  %3103 = vmatprep.mubr.bf16.mxu1 %v936_v8 }
 0x155   : > { %2766 = vmatpush1.bf16.msra.mxu0 %v4642_v9  ;;  %3131 = vmatpush1.bf16.msra.mxu1 %v4645_v10 }
 0x156   : > { %2767 = vmatprep.subr.bf16.mxu0 %v4650_v11  ;;  %3132 = vmatprep.subr.bf16.mxu1 %v4653_v12 }
 0x158   : > { %2739 = vmatmul.mubr.bf16.gmra.mrb[8].mxu0 %v920_v15  ;;  %3104 = vmatmul.mubr.bf16.gmra.mrb[8].mxu1 %v920_v15 }
 0x159   : > { %2768 = vmatpush1.bf16.msra.mxu0 %v4648_v13  ;;  %3133 = vmatpush1.bf16.msra.mxu1 %v4651_v14 }
 0x15a   : > { %2769 = vmatprep.subr.bf16.mxu0 %v4656_v16  ;;  %3134 = vmatprep.subr.bf16.mxu1 %v4659_v17 }
 0x15b   : > { %2748 = vmatprep.mubr.bf16.mxu0 %v937_v18  ;;  %3113 = vmatprep.mubr.bf16.mxu1 %v937_v18 }
 0x15d   : > { %2770 = vmatpush1.bf16.msra.mxu0 %v4654_v19  ;;  %3135 = vmatpush1.bf16.msra.mxu1 %v4657_v20 }
 0x15e   : > { %2771 = vmatprep.subr.bf16.mxu0 %v4662_v21  ;;  %3136 = vmatprep.subr.bf16.mxu1 %v4665_v22 }
 0x160   : > { %2749 = vmatmul.mubr.bf16.gmra.mrb[12].mxu0 %v921_v25  ;;  %3114 = vmatmul.mubr.bf16.gmra.mrb[12].mxu1 %v921_v25 }
 0x161   : > { %2772 = vmatpush1.bf16.msra.mxu0 %v4660_v23  ;;  %3137 = vmatpush1.bf16.msra.mxu1 %v4663_v24 }
 0x162   : > { %2773 = vmatprep.subr.bf16.mxu0 %v4668_v26  ;;  %3138 = vmatprep.subr.bf16.mxu1 %v4671_v27 }
 0x163   : > { %3957 = vmatprep.mubr.msk.bf16.mxu0 %vm2454_vm0, %v966_v28  ;;  %3961 = vmatprep.mubr.msk.bf16.mxu1 %vm2454_vm0, %v966_v28 }
 0x165   : > { %2774 = vmatpush1.bf16.msra.mxu0 %v4666_v29  ;;  %3139 = vmatpush1.bf16.msra.mxu1 %v4669_v30 }
 0x166   : > { %2775 = vmatprep.subr.bf16.mxu0 %v4674_v31  ;;  %3140 = vmatprep.subr.bf16.mxu1 %v4677_v32 }
 0x169   : > { %2776 = vmatpush1.bf16.msra.mxu0 %v4672_v33  ;;  %3141 = vmatpush1.bf16.msra.mxu1 %v4675_v34 }
 0x16a   : > { %2777 = vmatprep.subr.bf16.mxu0 %v4680_v35  ;;  %3142 = vmatprep.subr.bf16.mxu1 %v4683_v36 }
 0x16d   : > { %2778 = vmatpush1.bf16.msra.mxu0 %v4678_v37  ;;  %3143 = vmatpush1.bf16.msra.mxu1 %v4681_v38 }
 0x170   : > { %2792 = vmatmul.mubr.bf16.vlgmr.msra.gmra.mrb[0].mxu0 %v950_v39  ;;  %3157 = vmatmul.mubr.bf16.vlgmr.msra.gmra.mrb[0].mxu1 %v950_v39 }
 0x171   : > { %3958 = vmatprep.mubr.msk.bf16.mxu0 %vm2454_vm0, %v967_v40  ;;  %3962 = vmatprep.mubr.msk.bf16.mxu1 %vm2454_vm0, %v967_v40 }
 0x178   : > { %2802 = vmatmul.mubr.bf16.gmra.mrb[4].mxu0 %v951_v41  ;;  %3167 = vmatmul.mubr.bf16.gmra.mrb[4].mxu1 %v951_v41 }
 0x179   : > { %3959 = vmatprep.mubr.msk.bf16.mxu0 %vm2454_vm0, %v968_v42  ;;  %3963 = vmatprep.mubr.msk.bf16.mxu1 %vm2454_vm0, %v968_v42 }
 0x180   : > { %2812 = vmatmul.mubr.bf16.gmra.mrb[8].mxu0 %v952_v43  ;;  %3177 = vmatmul.mubr.bf16.gmra.mrb[8].mxu1 %v952_v43 }
 0x181   : > { %3960 = vmatprep.mubr.msk.bf16.mxu0 %vm2454_vm0, %v969_v44  ;;  %3964 = vmatprep.mubr.msk.bf16.mxu1 %vm2454_vm0, %v969_v44 }
 0x188   : > { %2822 = vmatmul.mubr.bf16.gmra.mrb[12].mxu0 %v953_v45  ;;  %3187 = vmatmul.mubr.bf16.gmra.mrb[12].mxu1 %v953_v45 }
 0x243   : > { %v2793_v57 = vpop.f32.mrb[0].mxu0  ;;  %v3158_v58 = vpop.f32.mrb[0].mxu1 }
 0x244   : > { %v4011_v59 = vadd.f32 %v2793_v57, %v5972_v53  ;;  %v4027_v60 = vadd.f32 %v3158_v58, %v5974_v54  ;;  %v2795_v61 = vpop.f32.mrb[1].mxu0  ;;  %v3160_v62 = vpop.f32.mrb[1].mxu1 }
 0x245   : > { %v4012_v63 = vadd.f32 %v2795_v61, %v5979_v55  ;;  %v4028_v0 = vadd.f32 %v3160_v62, %v5981_v56  ;;  %v2797_v1 = vpop.f32.mrb[2].mxu0  ;;  %v3162_v2 = vpop.f32.mrb[2].mxu1 }
 0x246   : > { %v4013_v3 = vadd.f32 %v2797_v1, %v5972_v53  ;;  %v4029_v4 = vadd.f32 %v3162_v2, %v5974_v54  ;;  %v2799_v5 = vpop.f32.mrb[3].mxu0  ;;  %v3164_v6 = vpop.f32.mrb[3].mxu1  ;;  %v3361_v7 = vmul.f32 %v4011_v59, %v4011_v59  ;;  %v3363_v8 = vmul.f32 %v4027_v60, %v4027_v60 }
 0x247   : > { %v3992_v9 = vpack.c.bf16 %v4012_v63, %v4011_v59  ;;  %v3993_v10 = vpack.c.bf16 %v4028_v0, %v4027_v60  ;;  %v4014_v15 = vadd.f32 %v2799_v5, %v5979_v55  ;;  %v4030_v16 = vadd.f32 %v3164_v6, %v5981_v56 }
 0x248   : > { %v3309_v11 = vadd.f32 %v4013_v3, %v4011_v59  ;;  %v3365_v12 = vmul.f32 %v4013_v3, %v4013_v3  ;;  %v3335_v13 = vadd.f32 %v4029_v4, %v4027_v60  ;;  %v3367_v14 = vmul.f32 %v4029_v4, %v4029_v4 }
 0x249   : > { %3293 = vst [vmem:[%s5990_s10] sm:$0xff] %v3992_v9  ;;  %3294 = vst [vmem:[%s5990_s10 + $0x8] sm:$0xff] %v3993_v10  ;;  %v3362_v17 = vmul.f32 %v4012_v63, %v4012_v63  ;;  %v3364_v18 = vmul.f32 %v4028_v0, %v4028_v0  ;;  %v3994_v21 = vpack.c.bf16 %v4014_v15, %v4013_v3 }
 0x24a   : > { %v3393_v19 = vadd.f32 %v3365_v12, %v3361_v7  ;;  %v3419_v20 = vadd.f32 %v3367_v14, %v3363_v8  ;;  %v3322_v22 = vadd.f32 %v4014_v15, %v4012_v63  ;;  %v3366_v23 = vmul.f32 %v4014_v15, %v4014_v15 }
 0x24b   : > { %v3995_v24 = vpack.c.bf16 %v4030_v16, %v4029_v4  ;;  %v2803_v25 = vpop.f32.mrb[4].mxu0  ;;  %v3168_v26 = vpop.f32.mrb[4].mxu1  ;;  %v3348_v27 = vadd.f32 %v4030_v16, %v4028_v0  ;;  %v3368_v28 = vmul.f32 %v4030_v16, %v4030_v16  ;;  %3295 = vst [vmem:[%s5990_s10 + $0x10] sm:$0xff] %v3994_v21 }
 0x24c   : > { %v4015_v29 = vadd.f32 %v2803_v25, %v5972_v53  ;;  %v4031_v30 = vadd.f32 %v3168_v26, %v5974_v54  ;;  %v2805_v31 = vpop.f32.mrb[5].mxu0  ;;  %v3170_v32 = vpop.f32.mrb[5].mxu1  ;;  %v3406_v33 = vadd.f32 %v3366_v23, %v3362_v17 }
 0x24d   : > { %3296 = vst [vmem:[%s5990_s10 + $0x18] sm:$0xff] %v3995_v24  ;;  %v4016_v34 = vadd.f32 %v2805_v31, %v5979_v55  ;;  %v4032_v35 = vadd.f32 %v3170_v32, %v5981_v56  ;;  %v2807_v36 = vpop.f32.mrb[6].mxu0  ;;  %v3172_v37 = vpop.f32.mrb[6].mxu1  ;;  %v3432_v38 = vadd.f32 %v3368_v28, %v3364_v18 }
 0x24e   : > { %v3310_v39 = vadd.f32 %v4015_v29, %v3309_v11  ;;  %v3369_v40 = vmul.f32 %v4015_v29, %v4015_v29  ;;  %v3336_v41 = vadd.f32 %v4031_v30, %v3335_v13  ;;  %v2809_v42 = vpop.f32.mrb[7].mxu0  ;;  %v3174_v43 = vpop.f32.mrb[7].mxu1  ;;  %v3371_v44 = vmul.f32 %v4031_v30, %v4031_v30 }
 0x24f   : > { %v3996_v45 = vpack.c.bf16 %v4016_v34, %v4015_v29  ;;  %v3323_v46 = vadd.f32 %v4016_v34, %v3322_v22  ;;  %v3370_v47 = vmul.f32 %v4016_v34, %v4016_v34  ;;  %v3997_v49 = vpack.c.bf16 %v4032_v35, %v4031_v30 }
 0x250   : > { %v3394_v48 = vadd.f32 %v3393_v19, %v3369_v40  ;;  %v3349_v50 = vadd.f32 %v4032_v35, %v3348_v27  ;;  %v3372_v51 = vmul.f32 %v4032_v35, %v4032_v35  ;;  %v3420_v52 = vadd.f32 %v3419_v20, %v3371_v44 }
 0x251   : > { %3297 = vst [vmem:[%s5990_s10 + $0x20] sm:$0xff] %v3996_v45  ;;  %v3407_v57 = vadd.f32 %v3406_v33, %v3370_v47  ;;  %v4017_v58 = vadd.f32 %v2807_v36, %v5972_v53  ;;  %v4033_v59 = vadd.f32 %v3172_v37, %v5974_v54  ;;  %3298 = vst [vmem:[%s5990_s10 + $0x28] sm:$0xff] %v3997_v49 }
 0x252   : > { %v3433_v60 = vadd.f32 %v3432_v38, %v3372_v51  ;;  %v4018_v61 = vadd.f32 %v2809_v42, %v5979_v55  ;;  %v4034_v62 = vadd.f32 %v3174_v43, %v5981_v56 }
 0x253   : > { %v3311_v63 = vadd.f32 %v4017_v58, %v3310_v39  ;;  %v3373_v0 = vmul.f32 %v4017_v58, %v4017_v58  ;;  %v3337_v1 = vadd.f32 %v4033_v59, %v3336_v41  ;;  %v3375_v2 = vmul.f32 %v4033_v59, %v4033_v59  ;;  %v2813_v3 = vpop.f32.mrb[8].mxu0  ;;  %v3178_v4 = vpop.f32.mrb[8].mxu1 }
 0x254   : > { %v3998_v5 = vpack.c.bf16 %v4018_v61, %v4017_v58  ;;  %v3324_v6 = vadd.f32 %v4018_v61, %v3323_v46  ;;  %v3374_v7 = vmul.f32 %v4018_v61, %v4018_v61  ;;  %v3999_v8 = vpack.c.bf16 %v4034_v62, %v4033_v59  ;;  %v2815_v9 = vpop.f32.mrb[9].mxu0  ;;  %v3180_v10 = vpop.f32.mrb[9].mxu1 }
 0x255   : > { %v3395_v11 = vadd.f32 %v3394_v48, %v3373_v0  ;;  %v3421_v12 = vadd.f32 %v3420_v52, %v3375_v2  ;;  %v3350_v13 = vadd.f32 %v4034_v62, %v3349_v50  ;;  %v3376_v14 = vmul.f32 %v4034_v62, %v4034_v62  ;;  %v2817_v15 = vpop.f32.mrb[10].mxu0  ;;  %v3182_v16 = vpop.f32.mrb[10].mxu1 }
 0x256   : > { %3299 = vst [vmem:[%s5990_s10 + $0x30] sm:$0xff] %v3998_v5  ;;  %v3408_v17 = vadd.f32 %v3407_v57, %v3374_v7  ;;  %3300 = vst [vmem:[%s5990_s10 + $0x38] sm:$0xff] %v3999_v8  ;;  %v4019_v18 = vadd.f32 %v2813_v3, %v5972_v53  ;;  %v4035_v19 = vadd.f32 %v3178_v4, %v5974_v54  ;;  %v2819_v21 = vpop.f32.mrb[11].mxu0  ;;  %v3184_v22 = vpop.f32.mrb[11].mxu1 }
 0x257   : > { %v4020_v20 = vadd.f32 %v2815_v9, %v5979_v55  ;;  %v3434_v23 = vadd.f32 %v3433_v60, %v3376_v14  ;;  %v4036_v24 = vadd.f32 %v3180_v10, %v5981_v56  ;;  %v4021_v25 = vadd.f32 %v2817_v15, %v5972_v53 }
 0x258   : > { %v4037_v26 = vadd.f32 %v3182_v16, %v5974_v54  ;;  %v3312_v27 = vadd.f32 %v4019_v18, %v3311_v63  ;;  %v3377_v28 = vmul.f32 %v4019_v18, %v4019_v18  ;;  %v3338_v29 = vadd.f32 %v4035_v19, %v3337_v1 }
 0x259   : > { %v3379_v30 = vmul.f32 %v4035_v19, %v4035_v19  ;;  %v4000_v31 = vpack.c.bf16 %v4020_v20, %v4019_v18  ;;  %v3325_v32 = vadd.f32 %v4020_v20, %v3324_v6  ;;  %v3378_v33 = vmul.f32 %v4020_v20, %v4020_v20 }
 0x25a   : > { %v4001_v34 = vpack.c.bf16 %v4036_v24, %v4035_v19  ;;  %v3396_v35 = vadd.f32 %v3395_v11, %v3377_v28  ;;  %v3351_v37 = vadd.f32 %v4036_v24, %v3350_v13  ;;  %v3380_v38 = vmul.f32 %v4036_v24, %v4036_v24 }
 0x25b   : > { %v3422_v36 = vadd.f32 %v3421_v12, %v3379_v30  ;;  %3301 = vst [vmem:[%s5990_s10 + $0x40] sm:$0xff] %v4000_v31  ;;  %v3409_v39 = vadd.f32 %v3408_v17, %v3378_v33  ;;  %v3313_v40 = vadd.f32 %v4021_v25, %v3312_v27  ;;  %v3381_v41 = vmul.f32 %v4021_v25, %v4021_v25  ;;  %v2823_v43 = vpop.f32.mrb[12].mxu0  ;;  %v3188_v44 = vpop.f32.mrb[12].mxu1 }
 0x25c   : > { %3302 = vst [vmem:[%s5990_s10 + $0x48] sm:$0xff] %v4001_v34  ;;  %v3339_v42 = vadd.f32 %v4037_v26, %v3338_v29  ;;  %v3435_v45 = vadd.f32 %v3434_v23, %v3380_v38  ;;  %v3383_v46 = vmul.f32 %v4037_v26, %v4037_v26  ;;  %v4022_v47 = vadd.f32 %v2819_v21, %v5979_v55  ;;  %v2825_v49 = vpop.f32.mrb[13].mxu0  ;;  %v3190_v50 = vpop.f32.mrb[13].mxu1 }
 0x25d   : > { %v4038_v48 = vadd.f32 %v3184_v22, %v5981_v56  ;;  %v3397_v51 = vadd.f32 %v3396_v35, %v3381_v41  ;;  %v4023_v52 = vadd.f32 %v2823_v43, %v5972_v53  ;;  %v4039_v57 = vadd.f32 %v3188_v44, %v5974_v54  ;;  %v2827_v59 = vpop.f32.mrb[14].mxu0  ;;  %v3192_v60 = vpop.f32.mrb[14].mxu1 }
 0x25e   : > { %v4024_v58 = vadd.f32 %v2825_v49, %v5979_v55  ;;  %v3423_v61 = vadd.f32 %v3422_v36, %v3383_v46  ;;  %v4002_v62 = vpack.c.bf16 %v4022_v47, %v4021_v25  ;;  %v3326_v63 = vadd.f32 %v4022_v47, %v3325_v32  ;;  %v2829_v1 = vpop.f32.mrb[15].mxu0  ;;  %v3194_v2 = vpop.f32.mrb[15].mxu1 }
 0x25f   : > { %v3382_v0 = vmul.f32 %v4022_v47, %v4022_v47  ;;  %v4003_v3 = vpack.c.bf16 %v4038_v48, %v4037_v26  ;;  %v3352_v4 = vadd.f32 %v4038_v48, %v3351_v37  ;;  %v3384_v5 = vmul.f32 %v4038_v48, %v4038_v48 }
 0x260   : > { %v3314_v6 = vadd.f32 %v4023_v52, %v3313_v40  ;;  %3303 = vst [vmem:[%s5990_s10 + $0x50] sm:$0xff] %v4002_v62  ;;  %v3385_v8 = vmul.f32 %v4023_v52, %v4023_v52  ;;  %v3340_v9 = vadd.f32 %v4039_v57, %v3339_v42  ;;  %v3387_v10 = vmul.f32 %v4039_v57, %v4039_v57 }
 0x261   : > { %v3410_v7 = vadd.f32 %v3409_v39, %v3382_v0  ;;  %3304 = vst [vmem:[%s5990_s10 + $0x58] sm:$0xff] %v4003_v3  ;;  %v3436_v11 = vadd.f32 %v3435_v45, %v3384_v5  ;;  %v4004_v12 = vpack.c.bf16 %v4024_v58, %v4023_v52  ;;  %v3327_v13 = vadd.f32 %v4024_v58, %v3326_v63 }
 0x262   : > { %v3386_v14 = vmul.f32 %v4024_v58, %v4024_v58  ;;  %v3398_v15 = vadd.f32 %v3397_v51, %v3385_v8  ;;  %v3424_v16 = vadd.f32 %v3423_v61, %v3387_v10  ;;  %v4040_v17 = vadd.f32 %v3190_v50, %v5981_v56 }
 0x263   : > { %v4025_v18 = vadd.f32 %v2827_v59, %v5972_v53  ;;  %3305 = vst [vmem:[%s5990_s10 + $0x60] sm:$0xff] %v4004_v12  ;;  %v4041_v20 = vadd.f32 %v3192_v60, %v5974_v54  ;;  %v4026_v21 = vadd.f32 %v2829_v1, %v5979_v55  ;;  %v4042_v22 = vadd.f32 %v3194_v2, %v5981_v56 }
 0x264   : > { %v3411_v19 = vadd.f32 %v3410_v7, %v3386_v14  ;;  %v4005_v23 = vpack.c.bf16 %v4040_v17, %v4039_v57  ;;  %v3353_v24 = vadd.f32 %v4040_v17, %v3352_v4  ;;  %v3388_v25 = vmul.f32 %v4040_v17, %v4040_v17 }
 0x265   : > { %v3315_v26 = vadd.f32 %v4025_v18, %v3314_v6  ;;  %v3389_v27 = vmul.f32 %v4025_v18, %v4025_v18  ;;  %v3341_v28 = vadd.f32 %v4041_v20, %v3340_v9  ;;  %v3391_v29 = vmul.f32 %v4041_v20, %v4041_v20 }
 0x266   : > { %v4006_v53 = vpack.c.bf16 %v4026_v21, %v4025_v18  ;;  %3306 = vst [vmem:[%s5990_s10 + $0x68] sm:$0xff] %v4005_v23  ;;  %v3437_v30 = vadd.f32 %v3436_v11, %v3388_v25  ;;  %v3328_v32 = vadd.f32 %v4026_v21, %v3327_v13  ;;  %v3390_v54 = vmul.f32 %v4026_v21, %v4026_v21 }
 0x267   : > { %v3316_v31 = vrot.slane %v3315_v26, 4  ;;  %v3399_v55 = vadd.f32 %v3398_v15, %v3389_v27  ;;  %v3342_v56 = vrot.slane %v3341_v28, 4  ;;  %v3425_v33 = vadd.f32 %v3424_v16, %v3391_v29 }
 0x268   : > { %3307 = vst [vmem:[%s5990_s10 + $0x70] sm:$0xff] %v4006_v53  ;;  %v4007_v34 = vpack.c.bf16 %v4042_v22, %v4041_v20  ;;  %v3329_v36 = vrot.slane %v3328_v32, 4  ;;  %v3412_v37 = vadd.f32 %v3411_v19, %v3390_v54  ;;  %v3354_v38 = vadd.f32 %v4042_v22, %v3353_v24 }
 0x269   : > { %v3317_v35 = vadd.f32 %v3316_v31, %v3315_v26  ;;  %v3400_v39 = vrot.slane %v3399_v55, 4  ;;  %v3343_v40 = vadd.f32 %v3342_v56, %v3341_v28  ;;  %v3426_v41 = vrot.slane %v3425_v33, 4 }
 0x26a   : > { %3308 = vst [vmem:[%s5990_s10 + $0x78] sm:$0xff] %v4007_v34  ;;  %v3392_v42 = vmul.f32 %v4042_v22, %v4042_v22  ;;  %v3330_v44 = vadd.f32 %v3329_v36, %v3328_v32  ;;  %v3413_v45 = vrot.slane %v3412_v37, 4  ;;  %v3355_v46 = vrot.slane %v3354_v38, 4 }
 0x26b   : > { %v3318_v43 = vrot.slane %v3317_v35, 2 }
 0x26c   : > { %4697 = shalt.err (!%p4694_p5)
}
 0x26d   : > { %s4698_s9 = scalar_lea.hbm %s6037_s16, 2048  ;;  %s4702_s14 = scalar_lea.hbm %s6172_s3, 4096 }
 0x26e   : > { %p4699_p6 = scmp.ne.s32.totalorder %s6037_s16, %s4698_s9  ;;  %p4703_p10 = scmp.lt.u32.totalorder %s6037_s16, %s6172_s3 }
 0x26f   : > { %p4704_p11 = scmp.lt.u32.totalorder %s4702_s14, %s4698_s9  ;;  %p4706_p13 = scmp.lt.u32.totalorder %s4698_s9, %s6037_s16 }
 0x270   : > { %p4700_p7 = pnand %p4699_p6, %p4901_p4 }
 0x271   : > { %p4705_p12 = por %p4704_p11, %p4703_p10 }
 0x272   : > { %p4701_p9 = pneg %p4700_p7 }
 0x273   : > { %p4707_p0 = por %p4706_p13, %p4705_p12 }
 0x275   : > { %p4708_p1 = pnand %p4707_p0, %p4701_p9 }
 0x277   : > { %4711 = shalt.err (!%p4708_p1)
}
 0x278   : > { %s4825_s27 = smov 256   ;;  %s4826_s15 = smov 16   ;;  %v3401_v47 = vadd.f32 %v3400_v39, %v3399_v55  ;;  %v3344_v48 = vrot.slane %v3343_v40, 2  ;;  %v3427_v49 = vadd.f32 %v3426_v41, %v3425_v33  ;;  %v3438_v50 = vadd.f32 %v3437_v30, %v3392_v42 }
 0x279   : > { %4172 = dma.vmem_to_hbm [thread:$0]  (%p4901_p4), %s6039_s13, 2048, %s6037_s16, %s3454_s17, %s4825_s27, %s4825_s27, %s4826_s15   ;;  %v3319_v51 = vadd.f32 %v3318_v43, %v3317_v35  ;;  %v3331_v52 = vrot.slane %v3330_v44, 2  ;;  %v3414_v57 = vadd.f32 %v3413_v45, %v3412_v37  ;;  %v3356_v58 = vadd.f32 %v3355_v46, %v3354_v38 }
 0x27a   : > { %s3658_s7 = sshll.u32 %s5977_s8, 5  ;;  %v3402_v59 = vrot.slane %v3401_v47, 2  ;;  %v3345_v60 = vadd.f32 %v3344_v48, %v3343_v40  ;;  %v3428_v61 = vrot.slane %v3427_v49, 2  ;;  %v3439_v62 = vrot.slane %v3438_v50, 4  ;;  %s6070_s13 = sand.u32 1, %s3652_s24  }
 0x27b   : > { %v3320_v63 = vrot.slane %v3319_v51, 1  ;;  %v3332_v0 = vadd.f32 %v3331_v52, %v3330_v44  ;;  %v3415_v1 = vrot.slane %v3414_v57, 2  ;;  %v3357_v2 = vrot.slane %v3356_v58, 2  ;;  %s4009_s16 = sshll.u32 %s4814_s21, 9  ;;  %s254_s17 = scalar_lea.vmem [#allocation4], %s3658_s7 }
 0x27c   : > { %v3403_v3 = vadd.f32 %v3402_v59, %v3401_v47  ;;  %v3346_v4 = vrot.slane %v3345_v60, 1  ;;  %v3429_v5 = vadd.f32 %v3428_v61, %v3427_v49  ;;  %v3440_v6 = vadd.f32 %v3439_v62, %v3438_v50  ;;  %s3498_s9 = sshll.u32 %s254_s17, 4  ;;  %s6077_s24 = scalar_lea.vmem [#allocation6], %s3658_s7  ;;  %s6085_s9 = int_to_ptr.vmem [resolvable:$true] %s3498_s9 }
 0x27d   : > { %v3321_v7 = vadd.f32 %v3320_v63, %v3319_v51  ;;  %v3333_v8 = vrot.slane %v3332_v0, 1  ;;  %v3416_v9 = vadd.f32 %v3415_v1, %v3414_v57  ;;  %v3358_v10 = vadd.f32 %v3357_v2, %v3356_v58  ;;  %s3513_s21 = sshll.u32 %s6077_s24, 4  ;;  %s6083_s14 = scalar_lea.hbm %s6173_s4, %s4009_s16  ;;  %s6095_s21 = int_to_ptr.vmem [resolvable:$true] %s3513_s21 }
 0x27e   : > { %v3404_v11 = vrot.slane %v3403_v3, 1  ;;  %v3347_v12 = vadd.f32 %v3346_v4, %v3345_v60  ;;  %v3430_v13 = vrot.slane %v3429_v5, 1  ;;  %v3441_v14 = vrot.slane %v3440_v6, 2  ;;  %s6093_s29 = scalar_lea.hbm %s6174_s5, %s4009_s16  ;;  %s3459_s27 = scalar_lea.sflag [#allocation5], %s6070_s13 }
 0x27f   : > { %v3334_v15 = vadd.f32 %v3333_v8, %v3332_v0  ;;  %v3417_v16 = vrot.slane %v3416_v9, 1  ;;  %v3359_v17 = vrot.slane %v3358_v10, 1  ;;  %3445 = vst [vmem:[%s254_s17] sm:$0xff] %v3321_v7  ;;  %s4712_s15 = scalar_lea.vmem %s6085_s9, 512  ;;  %s4827_s7 = smov [#allocation4]  }
 0x280   : > { %v3405_v18 = vadd.f32 %v3404_v11, %v3403_v3  ;;  %v3431_v19 = vadd.f32 %v3430_v13, %v3429_v5  ;;  %v3442_v20 = vadd.f32 %v3441_v14, %v3440_v6  ;;  %3447 = vst [vmem:[%s254_s17 + $0x10] sm:$0xff] %v3347_v12  ;;  %p4713_p2 = scmp.ne.s32.totalorder %s6085_s9, %s4712_s15  ;;  %s4716_s10 = sshll.u32 %s4827_s7, 4  ;;  %s4717_s10 = int_to_ptr.vmem [resolvable:$false] %s4716_s10 }
 0x281   : > { %v3418_v21 = vadd.f32 %v3417_v16, %v3416_v9  ;;  %v3360_v22 = vadd.f32 %v3359_v17, %v3358_v10  ;;  %3446 = vst [vmem:[%s254_s17 + $0x8] sm:$0xff] %v3334_v15  ;;  %s4718_s12 = scalar_lea.vmem %s4717_s10, 1024  ;;  %p4719_p6 = scmp.lt.s32.totalorder %s6085_s9, %s4717_s10 }
 0x282   : > { %3449 = vst [vmem:[%s6077_s24] sm:$0xff] %v3405_v18  ;;  %3451 = vst [vmem:[%s6077_s24 + $0x10] sm:$0xff] %v3431_v19  ;;  %v3443_v23 = vrot.slane %v3442_v20, 1  ;;  %p4714_p3 = pnand %p4713_p2, %p4901_p4  ;;  %p4720_p7 = scmp.lt.s32.totalorder %s4718_s12, %s4712_s15 }
 0x283   : > { %3450 = vst [vmem:[%s6077_s24 + $0x8] sm:$0xff] %v3418_v21  ;;  %3448 = vst [vmem:[%s254_s17 + $0x18] sm:$0xff] %v3360_v22 }
 0x284   : > { %v3444_v24 = vadd.f32 %v3443_v23, %v3442_v20  ;;  %p4715_p5 = pneg %p4714_p3  ;;  %p4721_p9 = por %p4720_p7, %p4719_p6 }
 0x286   : > { %p4722_p10 = pnand %p4721_p9, %p4715_p5 }
 0x288   : > { %4725 = shalt.err (!%p4722_p10)
}
 0x289   : > { %s4726_s16 = scalar_lea.hbm %s6083_s14, 512  ;;  %s4730_s11 = scalar_lea.hbm %s6173_s4, 1024 }
 0x28a   : > { %p4727_p11 = scmp.ne.s32.totalorder %s6083_s14, %s4726_s16  ;;  %p4731_p0 = scmp.lt.u32.totalorder %s6083_s14, %s6173_s4 }
 0x28b   : > { %p4732_p1 = scmp.lt.u32.totalorder %s4730_s11, %s4726_s16  ;;  %p4734_p3 = scmp.lt.u32.totalorder %s4726_s16, %s6083_s14 }
 0x28c   : > { %p4728_p12 = pnand %p4727_p11, %p4901_p4 }
 0x28d   : > { %p4733_p2 = por %p4732_p1, %p4731_p0 }
 0x28e   : > { %p4729_p13 = pneg %p4728_p12 }
 0x28f   : > { %p4735_p5 = por %p4734_p3, %p4733_p2 }
 0x291   : > { %p4736_p6 = pnand %p4735_p5, %p4729_p13 }
 0x293   : > { %4739 = shalt.err (!%p4736_p6)
}
 0x294   : > { %4173 = dma.vmem_to_hbm [thread:$0]  (%p4901_p4), %s6085_s9, 512, %s6083_s14, %s3459_s27   ;;  %3452 = vst [vmem:[%s6077_s24 + $0x18] sm:$0xff] %v3444_v24 }
 0x295   : > { %s4740_s15 = scalar_lea.vmem %s6095_s21, 512  ;;  %s4828_s12 = smov [#allocation6]  }
 0x296   : > { %p4741_p7 = scmp.ne.s32.totalorder %s6095_s21, %s4740_s15  ;;  %s4744_s16 = sshll.u32 %s4828_s12, 4  ;;  %s4745_s16 = int_to_ptr.vmem [resolvable:$false] %s4744_s16 }
 0x297   : > { %s4746_s17 = scalar_lea.vmem %s4745_s16, 1024  ;;  %p4747_p11 = scmp.lt.s32.totalorder %s6095_s21, %s4745_s16 }
 0x298   : > { %p4742_p9 = pnand %p4741_p7, %p4901_p4  ;;  %p4748_p12 = scmp.lt.s32.totalorder %s4746_s17, %s4740_s15 }
 0x29a   : > { %p4743_p10 = pneg %p4742_p9  ;;  %p4749_p13 = por %p4748_p12, %p4747_p11 }
 0x29c   : > { %p4750_p0 = pnand %p4749_p13, %p4743_p10 }
 0x29e   : > { %4753 = shalt.err (!%p4750_p0)
}
 0x29f   : > { %s4754_s9 = scalar_lea.hbm %s6093_s29, 512  ;;  %s4758_s8 = scalar_lea.hbm %s6174_s5, 1024 }
 0x2a0   : > { %p4755_p1 = scmp.ne.s32.totalorder %s6093_s29, %s4754_s9  ;;  %p4759_p5 = scmp.lt.u32.totalorder %s6093_s29, %s6174_s5 }
 0x2a1   : > { %p4760_p6 = scmp.lt.u32.totalorder %s4758_s8, %s4754_s9  ;;  %p4762_p9 = scmp.lt.u32.totalorder %s4754_s9, %s6093_s29 }
 0x2a2   : > { %p4756_p2 = pnand %p4755_p1, %p4901_p4 }
 0x2a3   : > { %p4761_p7 = por %p4760_p6, %p4759_p5 }
 0x2a4   : > { %p4757_p3 = pneg %p4756_p2 }
 0x2a5   : > { %p4763_p10 = por %p4762_p9, %p4761_p7 }
 0x2a7   : > { %p4764_p11 = pnand %p4763_p10, %p4757_p3 }
 0x2a9   : > { %4767 = shalt.err (!%p4764_p11)
}
 0x2aa   : > { %4174 = dma.vmem_to_hbm [thread:$0]  (%p4901_p4), %s6095_s21, 512, %s6093_s29, %s3459_s27  }
 0x2ab PF: > { %p4188_p12 = scmp.ge.s32.totalorder %s4822_s23, 2  ;;  %s3525_s10 = sand.u32 1, %s4802_s18  }
 0x2ac   : > { %s3526_s15 = scalar_lea.sflag [#allocation3], %s3525_s10 }
 0x2ad   : > { %p4179_p13 = pnand %p4188_p12, %p4910_p8 }
 0x2af   : > { %4793 = dma.done.wait (!%p4179_p13), %s3526_s15, 2048  }
 0x2b0   : > { %4795 = vsyncadd (!%p4179_p13), %s3526_s15, 4294965248  ;;  %s3534_s12 = sand.u32 1, %s3653_s25  }
 0x2b1   : > { %s3535_s28 = scalar_lea.sflag [#allocation5], %s3534_s12 }
 0x2b2   : > { %4797 = dma.done.wait (!%p4179_p13), %s3535_s28, 1024  }
 0x2b3   : > { %4799 = vsyncadd (!%p4179_p13), %s3535_s28, 4294966272  ;;  %s22_s23 = sadd.s32 1, %s4822_s23   ;;  %s6177_s18 = smov %s4806_s19 }
 0x2b4   : > { %p19_p4 = scmp.ge.s32.totalorder %s22_s23, 4   ;;  %s6178_s19 = smov %s4810_s20 }
 0x2b5   : > { %s6179_s20 = smov %s4916_s6  ;;  %s6180_s21 = smov %s4818_s22 }
 0x2b6   : > { %s6181_s22 = smov %s6183_s26  ;;  %21 = sbr.rel (!%p19_p4) target bundleno = 6 (0x6), region = 99 }
 0x2bd   :  { %3549 = vsyncpa [#allocation3], 1 }
 0x2be   :  { %3551 = vsyncpa [#allocation3 + $0x1], 1 }
 0x2bf   :  { %3552 = vsyncpa [#allocation5], 1 }
 0x2c0   :  { %3554 = vsyncpa [#allocation5 + $0x1], 1 }

</bundles_post_ra>
